<compile_context>
chip_gen: v7x
topology: tpu7x:2x2x1
jax: 0.10.0
libtpu: 0.0.40
codegen_flags: <defaults>
</compile_context>

<pallas_src>
import functools

import jax
import jax.numpy as jnp
from jax.experimental import pallas as pl
from jax.experimental.pallas import tpu as pltpu

FEAT = 2048                 # in_features of the projector (fixed by the module)
SCALER_SIZE = 128           # scaler_size (projector output width)
OUT_LANES = 128             # lane-dense output slab width
DEFAULT_TILE_T = 2048       # rows of x streamed per grid step (long-T path)
DEFAULT_TARGET_ROWS = 1024  # target projector M (= TB*T) for the batched path
VMEM_LIMIT_BYTES = 48 * 1024 * 1024


# ----------------------------------------------------------------------------
# Batched (small-T) path: grid over batch blocks, projector M = TB*T.
# ----------------------------------------------------------------------------
def _chowder_batched_kernel(x_ref, il_ref, pw_ref, pb_ref,
                            w1_ref, b1_ref, w2_ref, b2_ref, w3_ref, b3_ref,
                            out_ref, *, tb, t, total_rows, use_bf16):
    # x_ref:  VMEM (tb*t, FEAT) -- TB batch elements' T rows, flattened
    # il_ref: VMEM (tb, 1)      -- 1/length per batch element of this block
    # out_ref: VMEM (tb, OUT_LANES)
    rows = tb * t
    x = x_ref[...]
    pw = pw_ref[...]
    if use_bf16:
        x = x.astype(jnp.bfloat16)
        pw = pw.astype(jnp.bfloat16)
    h = jnp.dot(x, pw, preferred_element_type=jnp.float32)        # (rows, S) MXU
    h = jnp.maximum(h + pb_ref[...], 0.0)                          # ReLU

    # Zero compiler-padded rows of a partial last batch block (they hold
    # unspecified VMEM data that would otherwise poison the segment matmul
    # via 0*NaN). Static no-op when B divides into whole blocks.
    if total_rows % rows != 0:
        gid = (jax.lax.broadcasted_iota(jnp.int32, (rows, 1), 0)
               + pl.program_id(0) * rows)
        h = jnp.where(gid < total_rows, h, 0.0)

    # Per-batch-element sum over T as a block-diagonal ones matmul; avoids an
    # in-kernel (rows,S)->(tb,t,S) reshape and works for any T. Cost is ~3% of
    # the projector matmul at worst and the kernel is HBM-bound anyway.
    r = jax.lax.broadcasted_iota(jnp.int32, (tb, rows), 0)
    c = jax.lax.broadcasted_iota(jnp.int32, (tb, rows), 1)
    lo = r * t
    seg = jnp.where((c >= lo) & (c < lo + t), 1.0, 0.0)
    pooled = jnp.dot(seg, h, preferred_element_type=jnp.float32)   # (tb, S)
    # torch ref divides the padded-sum by the true length (inf/NaN if 0, same
    # as the unguarded reference).
    pooled = pooled * il_ref[...]

    # Fused MLP head (dropouts are identity at inference).
    h1 = jax.nn.sigmoid(
        jnp.dot(pooled, w1_ref[...], preferred_element_type=jnp.float32)
        + b1_ref[...])
    h2 = jax.nn.sigmoid(
        jnp.dot(h1, w2_ref[...], preferred_element_type=jnp.float32)
        + b2_ref[...])
    h3 = jax.nn.sigmoid(
        jnp.dot(h2, w3_ref[...], preferred_element_type=jnp.float32)
        + b3_ref[...])                                              # (tb, 1)
    out_ref[...] = jnp.broadcast_to(h3, out_ref.shape).astype(out_ref.dtype)


def _forward_batched(x, lengths, params, *, tb, use_bf16):
    B, T, F = x.shape
    S = params["proj_w"].shape[1]
    x2d = x.reshape(B * T, F)                                   # contiguous view
    inv_len = (1.0 / lengths.astype(jnp.float32)).reshape(B, 1)
    num_blocks = pl.cdiv(B, tb)

    kernel = functools.partial(_chowder_batched_kernel, tb=tb, t=T,
                               total_rows=B * T, use_bf16=use_bf16)
    out = pl.pallas_call(
        kernel,
        out_shape=jax.ShapeDtypeStruct((B, OUT_LANES), jnp.float32),
        grid_spec=pltpu.PrefetchScalarGridSpec(
            num_scalar_prefetch=0,
            grid=(num_blocks,),
            in_specs=[
                pl.BlockSpec((tb * T, F), lambda i: (i, 0)),
                pl.BlockSpec((tb, 1), lambda i: (i, 0)),
                pl.BlockSpec((F, S), lambda i: (0, 0)),
                pl.BlockSpec((1, S), lambda i: (0, 0)),
                pl.BlockSpec((S, 200), lambda i: (0, 0)),
                pl.BlockSpec((1, 200), lambda i: (0, 0)),
                pl.BlockSpec((200, 100), lambda i: (0, 0)),
                pl.BlockSpec((1, 100), lambda i: (0, 0)),
                pl.BlockSpec((100, 1), lambda i: (0, 0)),
                pl.BlockSpec((1, 1), lambda i: (0, 0)),
            ],
            out_specs=pl.BlockSpec((tb, OUT_LANES), lambda i: (i, 0)),
        ),
        compiler_params=pltpu.CompilerParams(
            dimension_semantics=("parallel",),
            vmem_limit_bytes=VMEM_LIMIT_BYTES,
        ),
    )(x2d, inv_len,
      params["proj_w"], params["proj_b"],
      params["mlp_w1"], params["mlp_b1"],
      params["mlp_w2"], params["mlp_b2"],
      params["mlp_w3"], params["mlp_b3"])
    return out[:, 0]


# ----------------------------------------------------------------------------
# Streamed (long-T) path: grid = (B, num_t), VMEM accumulator over T tiles.
# ----------------------------------------------------------------------------
def _chowder_stream_kernel(len_ref, x_ref, pw_ref, pb_ref,
                           w1_ref, b1_ref, w2_ref, b2_ref, w3_ref, b3_ref,
                           out_ref, acc_ref, *, seq_len, tile_t, use_bf16):
    # len_ref: SMEM (B,) int32 lengths (scalar prefetch)
    # x_ref:   VMEM (1, tile_t, FEAT) -- one T tile of one batch element
    # out_ref: VMEM (1, 1, OUT_LANES); acc_ref: VMEM (1, S) scratch accumulator
    b = pl.program_id(0)
    t = pl.program_id(1)
    n_t = pl.num_programs(1)

    @pl.when(t == 0)
    def _():
        acc_ref[...] = jnp.zeros_like(acc_ref)

    x = x_ref[0]                                                   # (tile_t, F)
    pw = pw_ref[...]
    if use_bf16:
        x = x.astype(jnp.bfloat16)
        pw = pw.astype(jnp.bfloat16)
    h = jnp.dot(x, pw, preferred_element_type=jnp.float32)         # MXU
    h = jnp.maximum(h + pb_ref[...], 0.0)                          # ReLU

    @pl.when(t < n_t - 1)
    def _():
        acc_ref[...] += jnp.sum(h, axis=0, keepdims=True)          # (1, S)

    @pl.when(t == n_t - 1)
    def _():
        h_last = h
        # Only the last tile may contain compiler-padded rows past T; zero-pad
        # rows with index < T still contribute ReLU(bias), exactly like the
        # reference sum over the padded sequence.
        if seq_len % tile_t != 0:
            row = (jax.lax.broadcasted_iota(jnp.int32, (tile_t, 1), 0)
                   + t * tile_t)
            h_last = jnp.where(row < seq_len, h_last, 0.0)
        total = acc_ref[...] + jnp.sum(h_last, axis=0, keepdims=True)
        inv_len = 1.0 / len_ref[b].astype(jnp.float32)
        pooled = total * inv_len                                    # (1, S)
        h1 = jax.nn.sigmoid(
            jnp.dot(pooled, w1_ref[...], preferred_element_type=jnp.float32)
            + b1_ref[...])
        h2 = jax.nn.sigmoid(
            jnp.dot(h1, w2_ref[...], preferred_element_type=jnp.float32)
            + b2_ref[...])
        h3 = jax.nn.sigmoid(
            jnp.dot(h2, w3_ref[...], preferred_element_type=jnp.float32)
            + b3_ref[...])                                          # (1, 1)
        out_ref[...] = jnp.broadcast_to(h3, out_ref.shape).astype(out_ref.dtype)


def _forward_streamed(x, lengths, params, *, tile_t, use_bf16):
    B, T, F = x.shape
    S = params["proj_w"].shape[1]

    tile_t = min(tile_t, T)
    if tile_t < T:
        tile_t = max(8, (tile_t // 8) * 8)     # sublane-aligned T tiles
    num_t = pl.cdiv(T, tile_t)

    kernel = functools.partial(_chowder_stream_kernel, seq_len=T,
                               tile_t=tile_t, use_bf16=use_bf16)
    out = pl.pallas_call(
        kernel,
        out_shape=jax.ShapeDtypeStruct((B, 1, OUT_LANES), jnp.float32),
        grid_spec=pltpu.PrefetchScalarGridSpec(
            num_scalar_prefetch=1,
            grid=(B, num_t),
            in_specs=[
                pl.BlockSpec((1, tile_t, F), lambda b, t, lens: (b, t, 0)),
                pl.BlockSpec((F, S), lambda b, t, lens: (0, 0)),
                pl.BlockSpec((1, S), lambda b, t, lens: (0, 0)),
                pl.BlockSpec((S, 200), lambda b, t, lens: (0, 0)),
                pl.BlockSpec((1, 200), lambda b, t, lens: (0, 0)),
                pl.BlockSpec((200, 100), lambda b, t, lens: (0, 0)),
                pl.BlockSpec((1, 100), lambda b, t, lens: (0, 0)),
                pl.BlockSpec((100, 1), lambda b, t, lens: (0, 0)),
                pl.BlockSpec((1, 1), lambda b, t, lens: (0, 0)),
            ],
            out_specs=pl.BlockSpec((1, 1, OUT_LANES),
                                   lambda b, t, lens: (b, 0, 0)),
            scratch_shapes=[pltpu.VMEM((1, S), jnp.float32)],
        ),
        compiler_params=pltpu.CompilerParams(
            dimension_semantics=("parallel", "arbitrary"),
            vmem_limit_bytes=VMEM_LIMIT_BYTES,
        ),
    )(lengths, x,
      params["proj_w"], params["proj_b"],
      params["mlp_w1"], params["mlp_b1"],
      params["mlp_w2"], params["mlp_b2"],
      params["mlp_w3"], params["mlp_b3"])
    return out[:, 0, 0]


# ----------------------------------------------------------------------------
# Path selection + public entry point
# ----------------------------------------------------------------------------
def _choose_tb(B, T, target_rows):
    """Batch-block size for the batched path, or None to use the streamed path."""
    if T <= 0:
        return None
    tb = target_rows // T
    if tb >= B:
        return B                     # whole batch in a single block
    if tb >= 8:
        return (tb // 8) * 8         # multi-block: keep (8,128) alignment
    return None                      # T too large -> streamed T path


def deep_set_chowder_forward(x, lengths, params, *,
                             tile_t=DEFAULT_TILE_T,
                             target_rows=DEFAULT_TARGET_ROWS,
                             use_bf16_matmul=False,
                             force_long_path=False):
    """x: (B, T, 2048) f32, zero-padded; lengths: (B,) int. Returns (B,) f32."""
    B, T, F = x.shape
    assert F == FEAT
    lengths = lengths.astype(jnp.int32)

    tb = None if force_long_path else _choose_tb(B, T, target_rows)
    if tb is not None:
        return _forward_batched(x, lengths, params, tb=tb,
                                use_bf16=use_bf16_matmul)
    return _forward_streamed(x, lengths, params, tile_t=tile_t,
                             use_bf16=use_bf16_matmul)


# ----------------------------------------------------------------------------
# Reference, params, inputs, tests
# ----------------------------------------------------------------------------
def _reference_forward(x, lengths, params):
    h = jnp.maximum(x @ params["proj_w"] + params["proj_b"], 0.0)
    pooled = jnp.sum(h, axis=1) / lengths.astype(jnp.float32)[:, None]
    h = jax.nn.sigmoid(pooled @ params["mlp_w1"] + params["mlp_b1"])
    h = jax.nn.sigmoid(h @ params["mlp_w2"] + params["mlp_b2"])
    h = jax.nn.sigmoid(h @ params["mlp_w3"] + params["mlp_b3"])
    return h.squeeze(-1)


def init_params(key, scaler_size=SCALER_SIZE):
    ks = jax.random.split(key, 8)

    def lin(kw, kb, fan_in, fan_out):
        bound = 1.0 / jnp.sqrt(fan_in)
        w = jax.random.uniform(kw, (fan_in, fan_out), jnp.float32, -bound, bound)
        b = jax.random.uniform(kb, (1, fan_out), jnp.float32, -bound, bound)
        return w, b

    pw, pb = lin(ks[0], ks[1], FEAT, scaler_size)
    w1, b1 = lin(ks[2], ks[3], scaler_size, 200)
    w2, b2 = lin(ks[4], ks[5], 200, 100)
    w3, b3 = lin(ks[6], ks[7], 100, 1)
    return {"proj_w": pw, "proj_b": pb,
            "mlp_w1": w1, "mlp_b1": b1,
            "mlp_w2": w2, "mlp_b2": b2,
            "mlp_w3": w3, "mlp_b3": b3}


def _make_inputs(key, B, T, lengths):
    x = jax.random.normal(key, (B, T, FEAT), jnp.float32)
    # emulate pad_packed_sequence zero padding beyond each sequence length
    mask = (jnp.arange(T)[None, :] < lengths[:, None]).astype(jnp.float32)
    return x * mask[..., None]


if __name__ == "__main__":
    key = jax.random.PRNGKey(0)
    k_param, k_x1, k_x2, k_x3 = jax.random.split(key, 4)
    params = init_params(k_param)

    # Case 1: typical small-T bag -> batched path, single batch block.
    B, T = 2, 8
    lengths = jnp.array([8, 5], dtype=jnp.int32)
    x = _make_inputs(k_x1, B, T, lengths)
    out = jax.block_until_ready(deep_set_chowder_forward(x, lengths, params))
    ref = _reference_forward(x, lengths, params)
    assert out.shape == (B,)
    assert jnp.allclose(out, ref, rtol=1e-4, atol=1e-4), (out, ref)

    # Case 2: batched path with multiple batch blocks and a partial last block
    # (exercises the padded-batch-row mask and per-block pooling).
    B2, T2 = 12, 16
    lengths2 = jnp.arange(5, 17, dtype=jnp.int32)          # 5..16
    x2 = _make_inputs(k_x2, B2, T2, lengths2)
    out2 = jax.block_until_ready(
        deep_set_chowder_forward(x2, lengths2, params, target_rows=128))
    ref2 = _reference_forward(x2, lengths2, params)
    assert out2.shape == (B2,)
    assert jnp.allclose(out2, ref2, rtol=1e-4, atol=1e-4), (out2, ref2)

    # Case 3: streamed long-T path (T-tile accumulator, ragged last tile,
    # scalar-prefetched lengths), forced at small shapes for the test.
    B3, T3 = 2, 80
    lengths3 = jnp.array([80, 37], dtype=jnp.int32)
    x3 = _make_inputs(k_x3, B3, T3, lengths3)
    out3 = jax.block_until_ready(
        deep_set_chowder_forward(x3, lengths3, params, tile_t=32,
                                 force_long_path=True))
    ref3 = _reference_forward(x3, lengths3, params)
    assert out3.shape == (B3,)
    assert jnp.allclose(out3, ref3, rtol=1e-4, atol=1e-4), (out3, ref3)

    # Case 4: bf16 MXU operands for the projector dot (v5e optimization);
    # f32 accumulation, looser tolerance vs. the f32 reference.
    out4 = jax.block_until_ready(
        deep_set_chowder_forward(x, lengths, params, use_bf16_matmul=True))
    assert out4.shape == (B,)
    assert jnp.allclose(out4, ref, rtol=1e-2, atol=1e-2), (out4, ref)

    print("KERNEL_OK")
</pallas_src>

<mosaic_0001>
module attributes {stable_mosaic.version = 11 : i64} {
  func.func @_chowder_batched_kernel(%arg0: i32, %arg1: memref<16x2048xf32, #tpu.memory_space<vmem>>, %arg2: memref<2x1xf32, #tpu.memory_space<vmem>>, %arg3: memref<2048x128xf32, #tpu.memory_space<vmem>>, %arg4: memref<1x128xf32, #tpu.memory_space<vmem>>, %arg5: memref<128x200xf32, #tpu.memory_space<vmem>>, %arg6: memref<1x200xf32, #tpu.memory_space<vmem>>, %arg7: memref<200x100xf32, #tpu.memory_space<vmem>>, %arg8: memref<1x100xf32, #tpu.memory_space<vmem>>, %arg9: memref<100x1xf32, #tpu.memory_space<vmem>>, %arg10: memref<1x1xf32, #tpu.memory_space<vmem>>, %arg11: memref<2x128xf32, #tpu.memory_space<vmem>>) attributes {dimension_semantics = [#tpu.dimension_semantics<parallel>], iteration_bounds = array<i64: 1>, scalar_prefetch = 0 : i64, scratch_operands = 0 : i64, tpu.core_type = #tpu.core_type<tc>, window_params = [{transform_indices = @transform_0, window_bounds = array<i64: 16, 2048>}, {transform_indices = @transform_1, window_bounds = array<i64: 2, 1>}, {pipeline_mode = #tpu.pipeline_mode<synchronous>, transform_indices = @transform_2, window_bounds = array<i64: 2048, 128>}, {pipeline_mode = #tpu.pipeline_mode<synchronous>, transform_indices = @transform_3, window_bounds = array<i64: 1, 128>}, {pipeline_mode = #tpu.pipeline_mode<synchronous>, transform_indices = @transform_4, window_bounds = array<i64: 128, 200>}, {pipeline_mode = #tpu.pipeline_mode<synchronous>, transform_indices = @transform_5, window_bounds = array<i64: 1, 200>}, {pipeline_mode = #tpu.pipeline_mode<synchronous>, transform_indices = @transform_6, window_bounds = array<i64: 200, 100>}, {pipeline_mode = #tpu.pipeline_mode<synchronous>, transform_indices = @transform_7, window_bounds = array<i64: 1, 100>}, {pipeline_mode = #tpu.pipeline_mode<synchronous>, transform_indices = @transform_8, window_bounds = array<i64: 100, 1>}, {pipeline_mode = #tpu.pipeline_mode<synchronous>, transform_indices = @transform_9, window_bounds = array<i64: 1, 1>}, {transform_indices = @transform_10, window_bounds = array<i64: 2, 128>}]} {
    %c0 = arith.constant 0 : index
    %c0_0 = arith.constant 0 : index
    %0 = vector.load %arg1[%c0, %c0_0] : memref<16x2048xf32, #tpu.memory_space<vmem>>, vector<16x2048xf32>
    %c0_1 = arith.constant 0 : index
    %c0_2 = arith.constant 0 : index
    %1 = vector.load %arg3[%c0_1, %c0_2] : memref<2048x128xf32, #tpu.memory_space<vmem>>, vector<2048x128xf32>
    %cst = arith.constant dense<0.000000e+00> : vector<16x128xf32>
    %2 = tpu.matmul %0, %1, %cst {dimension_numbers = #tpu.dot_dimension_numbers<[1], [0], [0], [1], [0, 0, 1, 1], [], []>} : vector<16x2048xf32>, vector<2048x128xf32>, vector<16x128xf32> -> vector<16x128xf32>
    %c0_3 = arith.constant 0 : index
    %c0_4 = arith.constant 0 : index
    %3 = vector.load %arg4[%c0_3, %c0_4] : memref<1x128xf32, #tpu.memory_space<vmem>>, vector<1x128xf32>
    %4 = vector.broadcast %3 : vector<1x128xf32> to vector<16x128xf32>
    %5 = arith.addf %2, %4 : vector<16x128xf32>
    %cst_5 = arith.constant 0.000000e+00 : f32
    %6 = vector.broadcast %cst_5 : f32 to vector<16x128xf32>
    %7 = arith.maximumf %5, %6 : vector<16x128xf32>
    %8 = tpu.iota {dimensions = array<i32: 0>} : vector<2x16xi32>
    %9 = tpu.iota {dimensions = array<i32: 1>} : vector<2x16xi32>
    %c8_i32 = arith.constant 8 : i32
    %10 = vector.broadcast %c8_i32 : i32 to vector<2x16xi32>
    %11 = arith.muli %8, %10 : vector<2x16xi32>
    %12 = arith.cmpi sge, %9, %11 : vector<2x16xi32>
    %c8_i32_6 = arith.constant 8 : i32
    %13 = vector.broadcast %c8_i32_6 : i32 to vector<2x16xi32>
    %14 = arith.addi %11, %13 : vector<2x16xi32>
    %15 = arith.cmpi slt, %9, %14 : vector<2x16xi32>
    %16 = arith.andi %12, %15 : vector<2x16xi1>
    %cst_7 = arith.constant 1.000000e+00 : f32
    %cst_8 = arith.constant 0.000000e+00 : f32
    %17 = vector.broadcast %cst_7 : f32 to vector<2x16xf32>
    %18 = vector.broadcast %cst_8 : f32 to vector<2x16xf32>
    %19 = arith.select %16, %17, %18 : vector<2x16xi1>, vector<2x16xf32>
    %cst_9 = arith.constant dense<0.000000e+00> : vector<2x128xf32>
    %20 = tpu.matmul %19, %7, %cst_9 {dimension_numbers = #tpu.dot_dimension_numbers<[1], [0], [0], [1], [0, 0, 1, 1], [], []>} : vector<2x16xf32>, vector<16x128xf32>, vector<2x128xf32> -> vector<2x128xf32>
    %c0_10 = arith.constant 0 : index
    %c0_11 = arith.constant 0 : index
    %21 = vector.load %arg2[%c0_10, %c0_11] : memref<2x1xf32, #tpu.memory_space<vmem>>, vector<2x1xf32>
    %22 = vector.broadcast %21 : vector<2x1xf32> to vector<2x128xf32>
    %23 = arith.mulf %20, %22 : vector<2x128xf32>
    %c0_12 = arith.constant 0 : index
    %c0_13 = arith.constant 0 : index
    %24 = vector.load %arg5[%c0_12, %c0_13] : memref<128x200xf32, #tpu.memory_space<vmem>>, vector<128x200xf32>
    %cst_14 = arith.constant dense<0.000000e+00> : vector<2x200xf32>
    %25 = tpu.matmul %23, %24, %cst_14 {dimension_numbers = #tpu.dot_dimension_numbers<[1], [0], [0], [1], [0, 0, 1, 1], [], []>} : vector<2x128xf32>, vector<128x200xf32>, vector<2x200xf32> -> vector<2x200xf32>
    %c0_15 = arith.constant 0 : index
    %c0_16 = arith.constant 0 : index
    %26 = vector.load %arg6[%c0_15, %c0_16] : memref<1x200xf32, #tpu.memory_space<vmem>>, vector<1x200xf32>
    %27 = vector.broadcast %26 : vector<1x200xf32> to vector<2x200xf32>
    %28 = arith.addf %25, %27 : vector<2x200xf32>
    %29 = arith.negf %28 : vector<2x200xf32>
    %30 = math.exp %29 : vector<2x200xf32>
    %cst_17 = arith.constant 1.000000e+00 : f32
    %31 = vector.broadcast %cst_17 : f32 to vector<2x200xf32>
    %32 = arith.addf %31, %30 : vector<2x200xf32>
    %33 = arith.divf %31, %32 : vector<2x200xf32>
    %c0_18 = arith.constant 0 : index
    %c0_19 = arith.constant 0 : index
    %34 = vector.load %arg7[%c0_18, %c0_19] : memref<200x100xf32, #tpu.memory_space<vmem>>, vector<200x100xf32>
    %cst_20 = arith.constant dense<0.000000e+00> : vector<2x100xf32>
    %35 = tpu.matmul %33, %34, %cst_20 {dimension_numbers = #tpu.dot_dimension_numbers<[1], [0], [0], [1], [0, 0, 1, 1], [], []>} : vector<2x200xf32>, vector<200x100xf32>, vector<2x100xf32> -> vector<2x100xf32>
    %c0_21 = arith.constant 0 : index
    %c0_22 = arith.constant 0 : index
    %36 = vector.load %arg8[%c0_21, %c0_22] : memref<1x100xf32, #tpu.memory_space<vmem>>, vector<1x100xf32>
    %37 = vector.broadcast %36 : vector<1x100xf32> to vector<2x100xf32>
    %38 = arith.addf %35, %37 : vector<2x100xf32>
    %39 = arith.negf %38 : vector<2x100xf32>
    %40 = math.exp %39 : vector<2x100xf32>
    %cst_23 = arith.constant 1.000000e+00 : f32
    %41 = vector.broadcast %cst_23 : f32 to vector<2x100xf32>
    %42 = arith.addf %41, %40 : vector<2x100xf32>
    %43 = arith.divf %41, %42 : vector<2x100xf32>
    %c0_24 = arith.constant 0 : index
    %c0_25 = arith.constant 0 : index
    %44 = vector.load %arg9[%c0_24, %c0_25] : memref<100x1xf32, #tpu.memory_space<vmem>>, vector<100x1xf32>
    %cst_26 = arith.constant dense<0.000000e+00> : vector<2x1xf32>
    %45 = tpu.matmul %43, %44, %cst_26 {dimension_numbers = #tpu.dot_dimension_numbers<[1], [0], [0], [1], [0, 0, 1, 1], [], []>} : vector<2x100xf32>, vector<100x1xf32>, vector<2x1xf32> -> vector<2x1xf32>
    %c0_27 = arith.constant 0 : index
    %c0_28 = arith.constant 0 : index
    %46 = vector.load %arg10[%c0_27, %c0_28] : memref<1x1xf32, #tpu.memory_space<vmem>>, vector<1x1xf32>
    %47 = vector.broadcast %46 : vector<1x1xf32> to vector<2x1xf32>
    %48 = arith.addf %45, %47 : vector<2x1xf32>
    %49 = arith.negf %48 : vector<2x1xf32>
    %50 = math.exp %49 : vector<2x1xf32>
    %cst_29 = arith.constant 1.000000e+00 : f32
    %51 = vector.broadcast %cst_29 : f32 to vector<2x1xf32>
    %52 = arith.addf %51, %50 : vector<2x1xf32>
    %53 = arith.divf %51, %52 : vector<2x1xf32>
    %54 = vector.shape_cast %53 : vector<2x1xf32> to vector<2x1xf32>
    %55 = vector.broadcast %54 : vector<2x1xf32> to vector<2x128xf32>
    %c0_30 = arith.constant 0 : index
    %c0_31 = arith.constant 0 : index
    %56 = vector.load %arg11[%c0_30, %c0_31] : memref<2x128xf32, #tpu.memory_space<vmem>>, vector<2x128xf32>
    tpu.vector_store %arg11[%c0_30, %c0_31], %55 {strides = array<i32>} : memref<2x128xf32, #tpu.memory_space<vmem>>, vector<2x128xf32>,
    return
  }
  func.func @transform_0(%arg0: i32) -> (i32, i32) {
    %c0_i32 = arith.constant 0 : i32
    %c0_i32_0 = arith.constant 0 : i32
    return %arg0, %c0_i32 : i32, i32
  }
  func.func @transform_1(%arg0: i32) -> (i32, i32) {
    %c0_i32 = arith.constant 0 : i32
    %c0_i32_0 = arith.constant 0 : i32
    return %arg0, %c0_i32 : i32, i32
  }
  func.func @transform_2(%arg0: i32) -> (i32, i32) {
    %c0_i32 = arith.constant 0 : i32
    %c0_i32_0 = arith.constant 0 : i32
    %c0_i32_1 = arith.constant 0 : i32
    return %c0_i32, %c0_i32_0 : i32, i32
  }
  func.func @transform_3(%arg0: i32) -> (i32, i32) {
    %c0_i32 = arith.constant 0 : i32
    %c0_i32_0 = arith.constant 0 : i32
    %c0_i32_1 = arith.constant 0 : i32
    return %c0_i32, %c0_i32_0 : i32, i32
  }
  func.func @transform_4(%arg0: i32) -> (i32, i32) {
    %c0_i32 = arith.constant 0 : i32
    %c0_i32_0 = arith.constant 0 : i32
    %c0_i32_1 = arith.constant 0 : i32
    return %c0_i32, %c0_i32_0 : i32, i32
  }
  func.func @transform_5(%arg0: i32) -> (i32, i32) {
    %c0_i32 = arith.constant 0 : i32
    %c0_i32_0 = arith.constant 0 : i32
    %c0_i32_1 = arith.constant 0 : i32
    return %c0_i32, %c0_i32_0 : i32, i32
  }
  func.func @transform_6(%arg0: i32) -> (i32, i32) {
    %c0_i32 = arith.constant 0 : i32
    %c0_i32_0 = arith.constant 0 : i32
    %c0_i32_1 = arith.constant 0 : i32
    return %c0_i32, %c0_i32_0 : i32, i32
  }
  func.func @transform_7(%arg0: i32) -> (i32, i32) {
    %c0_i32 = arith.constant 0 : i32
    %c0_i32_0 = arith.constant 0 : i32
    %c0_i32_1 = arith.constant 0 : i32
    return %c0_i32, %c0_i32_0 : i32, i32
  }
  func.func @transform_8(%arg0: i32) -> (i32, i32) {
    %c0_i32 = arith.constant 0 : i32
    %c0_i32_0 = arith.constant 0 : i32
    %c0_i32_1 = arith.constant 0 : i32
    return %c0_i32, %c0_i32_0 : i32, i32
  }
  func.func @transform_9(%arg0: i32) -> (i32, i32) {
    %c0_i32 = arith.constant 0 : i32
    %c0_i32_0 = arith.constant 0 : i32
    %c0_i32_1 = arith.constant 0 : i32
    return %c0_i32, %c0_i32_0 : i32, i32
  }
  func.func @transform_10(%arg0: i32) -> (i32, i32) {
    %c0_i32 = arith.constant 0 : i32
    %c0_i32_0 = arith.constant 0 : i32
    return %arg0, %c0_i32 : i32, i32
  }
}

</mosaic_0001>

<bundles_post_ra>
// kernel: tpu_custom_call.1
= control target key start
LH: loop header
LB: loop body
LE: loop exit
PB: predicated region body
PF: predicated region fallthrough
CT: control target
= control target key end

     0   :  { %s2630_s0 = inlined_call_operand.vmem [shape: f32[16,2048], index: 0, kind: input, shape index: {}]   ;;  %s2631_s1 = inlined_call_operand.vmem [shape: f32[2,1], index: 1, kind: input, shape index: {}]   ;;  %s2632_s2 = inlined_call_operand.hbm [shape: f32[2048,128], index: 2, kind: input, shape index: {}]   ;;  %s2633_s3 = inlined_call_operand.vmem [shape: f32[1,128], index: 3, kind: input, shape index: {}]   ;;  %s2634_s4 = inlined_call_operand.vmem [shape: f32[128,200], index: 4, kind: input, shape index: {}]   ;;  %s2635_s5 = inlined_call_operand.vmem [shape: f32[1,200], index: 5, kind: input, shape index: {}]   ;;  %s2636_s6 = inlined_call_operand.vmem [shape: f32[200,100], index: 6, kind: input, shape index: {}]   ;;  %s2637_s7 = inlined_call_operand.vmem [shape: f32[1,100], index: 7, kind: input, shape index: {}]   ;;  %s2638_s8 = inlined_call_operand.vmem [shape: f32[100,1], index: 8, kind: input, shape index: {}]   ;;  %s2639_s9 = inlined_call_operand.<no memory space> [shape: f32[1,1], index: 9, kind: input, shape index: {}]   ;;  %s2640_s10 = inlined_call_operand.hbm [shape: f32[2,128], index: 10, kind: output, shape index: {}]  }
   0x1   :  { %v15_v0 = vstv %s2639_s9 }
   0x2   :  { %16 = vst [vmem:[#allocation2] sm:$0x1] %v15_v0 }
   0x3   :  { %17 = vsyncpa [#allocation4], 0 }
   0x4   :  { %18 = vsyncpa [#allocation5], 0  ;;  %s2190_s15 = smov [#allocation3]   ;;  %s2142_s19 = scalar_lea.hbm %s2632_s2, 32768 }
   0x5   :  { %s28_s16 = sshll.u32 %s2190_s15, 4  ;;  %p2143_p0 = scmp.ne.s32.totalorder %s2632_s2, %s2142_s19  ;;  %s29_s16 = int_to_ptr.vmem [resolvable:$true] %s28_s16 }
   0x6   :  { %p2146_p1 = scmp.lt.u32.totalorder %s2142_s19, %s2632_s2 }
   0x8   :  { %p2148_p2 = pnand %p2146_p1, %p2143_p0 }
   0xa   :  { %2151 = shalt.err (!%p2148_p2)
}
   0xb   :  { %s2152_s9 = scalar_lea.vmem %s29_s16, 32768  ;;  %p2157_p4 = scmp.lt.s32.totalorder %s29_s16, %s29_s16 }
   0xc   :  { %p2153_p3 = scmp.ne.s32.totalorder %s29_s16, %s2152_s9  ;;  %p2158_p5 = scmp.lt.s32.totalorder %s2152_s9, %s2152_s9 }
   0xe   :  { %p2159_p6 = por %p2158_p5, %p2157_p4 }
  0x10   :  { %p2160_p7 = pnand %p2159_p6, %p2153_p3 }
  0x12   :  { %2163 = shalt.err (!%p2160_p7)
}
  0x13   :  { %s2191_s24 = smov 128   ;;  %s2192_s25 = smov 8  }
  0x14   :  { %34 = dma.hbm_to_vmem [thread:$0]  %s2632_s2, 32768, %s29_s16, [#allocation4], %s2191_s24, %s2191_s24, %s2192_s25  }
  0x15   :  { %2186 = dma.done.wait [#allocation4], 32768  }
  0x16   :  { %2187 = vsyncadd [#allocation4], 4294934528  ;;  %v100_v1 = vld [vmem:[#allocation3 + $0x80] sm:$0xff]  ;;  %v101_v2 = vld [vmem:[#allocation3 + $0x88] sm:$0xff]  ;;  %vm2194_vm0 = vmmov 0   ;;  %vm959_vm4 = vcmask 130048  }
  0x17   :  { %v84_v3 = vld [vmem:[#allocation3] sm:$0xff]  ;;  %v1772_v4 = vpack.c.bf16 %v101_v2, %v100_v1  ;;  %v85_v5 = vld [vmem:[#allocation3 + $0x8] sm:$0xff]  ;;  %v102_v12 = vld [vmem:[#allocation3 + $0x90] sm:$0xff]  ;;  %vm1199_vm5 = vcmask 588800   ;;  %vm1303_vm6 = vcmask 1043456   ;;  %vm1299_vm7 = vcmask 818176  }
  0x18   :  { %v132_v6 = vld [vmem:[#allocation3 + $0x180] sm:$0xff]  ;;  %v133_v7 = vld [vmem:[#allocation3 + $0x188] sm:$0xff]  ;;  %v1774_v8 = vpack.c.bf16 %v85_v5, %v84_v3  ;;  %v103_v14 = vld [vmem:[#allocation3 + $0x98] sm:$0xff] }
  0x19   :  { %v1804_v9 = vpack.c.bf16 %v133_v7, %v132_v6  ;;  %v116_v10 = vld [vmem:[#allocation3 + $0x100] sm:$0xff]  ;;  %v117_v11 = vld [vmem:[#allocation3 + $0x108] sm:$0xff]  ;;  %1773 = vmatprep.subr.bf16.mxu0 %v1772_v4  ;;  %v86_v15 = vld [vmem:[#allocation3 + $0x10] sm:$0xff]  ;;  %v1776_v17 = vpack.c.bf16 %v103_v14, %v102_v12 }
  0x1a   :  { %v1806_v13 = vpack.c.bf16 %v117_v11, %v116_v10  ;;  %v87_v16 = vld [vmem:[#allocation3 + $0x18] sm:$0xff]  ;;  %1775 = vmatpush3.bf16.msra.mxu0 %v1774_v8  ;;  %v134_v19 = vld [vmem:[#allocation3 + $0x190] sm:$0xff]  ;;  %v104_v24 = vld [vmem:[#allocation3 + $0xa0] sm:$0xff] }
  0x1b   :  { %1805 = vmatprep.subr.bf16.mxu1 %v1804_v9  ;;  %v1778_v18 = vpack.c.bf16 %v87_v16, %v86_v15  ;;  %v135_v20 = vld [vmem:[#allocation3 + $0x198] sm:$0xff]  ;;  %v118_v21 = vld [vmem:[#allocation3 + $0x110] sm:$0xff]  ;;  %v105_v25 = vld [vmem:[#allocation3 + $0xa8] sm:$0xff]  ;;  %1777 = vmatprep.subr.bf16.mxu0 %v1776_v17 }
  0x1c   :  { %1807 = vmatpush3.bf16.msra.mxu1 %v1806_v13  ;;  %v1808_v22 = vpack.c.bf16 %v135_v20, %v134_v19  ;;  %v119_v23 = vld [vmem:[#allocation3 + $0x118] sm:$0xff]  ;;  %v1780_v27 = vpack.c.bf16 %v105_v25, %v104_v24  ;;  %v88_v28 = vld [vmem:[#allocation3 + $0x20] sm:$0xff]  ;;  %v89_v29 = vld [vmem:[#allocation3 + $0x28] sm:$0xff] }
  0x1d   :  { %v1810_v26 = vpack.c.bf16 %v119_v23, %v118_v21  ;;  %v136_v30 = vld [vmem:[#allocation3 + $0x1a0] sm:$0xff]  ;;  %v137_v31 = vld [vmem:[#allocation3 + $0x1a8] sm:$0xff]  ;;  %v1782_v34 = vpack.c.bf16 %v89_v29, %v88_v28  ;;  %v106_v36 = vld [vmem:[#allocation3 + $0xb0] sm:$0xff] }
  0x1e   :  { %1809 = vmatprep.subr.bf16.mxu1 %v1808_v22  ;;  %v120_v32 = vld [vmem:[#allocation3 + $0x120] sm:$0xff]  ;;  %v121_v33 = vld [vmem:[#allocation3 + $0x128] sm:$0xff]  ;;  %1779 = vmatpush3.bf16.msra.mxu0 %v1778_v18  ;;  %v1812_v35 = vpack.c.bf16 %v137_v31, %v136_v30  ;;  %v107_v37 = vld [vmem:[#allocation3 + $0xb8] sm:$0xff] }
  0x1f   :  { %v90_v38 = vld [vmem:[#allocation3 + $0x30] sm:$0xff]  ;;  %1781 = vmatprep.subr.bf16.mxu0 %v1780_v27  ;;  %v1814_v39 = vpack.c.bf16 %v121_v33, %v120_v32  ;;  %v1784_v40 = vpack.c.bf16 %v107_v37, %v106_v36  ;;  %v91_v41 = vld [vmem:[#allocation3 + $0x38] sm:$0xff]  ;;  %v108_v47 = vld [vmem:[#allocation3 + $0xc0] sm:$0xff] }
  0x20   :  { %1811 = vmatpush3.bf16.msra.mxu1 %v1810_v26  ;;  %v138_v42 = vld [vmem:[#allocation3 + $0x1b0] sm:$0xff]  ;;  %v139_v43 = vld [vmem:[#allocation3 + $0x1b8] sm:$0xff]  ;;  %v109_v48 = vld [vmem:[#allocation3 + $0xc8] sm:$0xff]  ;;  %v1786_v49 = vpack.c.bf16 %v91_v41, %v90_v38 }
  0x21   :  { %1813 = vmatprep.subr.bf16.mxu1 %v1812_v35  ;;  %v1816_v44 = vpack.c.bf16 %v139_v43, %v138_v42  ;;  %v122_v45 = vld [vmem:[#allocation3 + $0x130] sm:$0xff]  ;;  %v123_v46 = vld [vmem:[#allocation3 + $0x138] sm:$0xff]  ;;  %v140_v50 = vld [vmem:[#allocation3 + $0x1c0] sm:$0xff]  ;;  %v1788_v53 = vpack.c.bf16 %v109_v48, %v108_v47 }
  0x22   :  { %1783 = vmatpush3.bf16.msra.mxu0 %v1782_v34  ;;  %v141_v51 = vld [vmem:[#allocation3 + $0x1c8] sm:$0xff]  ;;  %v1818_v52 = vpack.c.bf16 %v123_v46, %v122_v45  ;;  %v92_v54 = vld [vmem:[#allocation3 + $0x40] sm:$0xff]  ;;  %v110_v59 = vld [vmem:[#allocation3 + $0xd0] sm:$0xff] }
  0x23   :  { %1785 = vmatprep.subr.bf16.mxu0 %v1784_v40  ;;  %v93_v55 = vld [vmem:[#allocation3 + $0x48] sm:$0xff]  ;;  %v124_v56 = vld [vmem:[#allocation3 + $0x140] sm:$0xff]  ;;  %v1820_v57 = vpack.c.bf16 %v141_v51, %v140_v50  ;;  %v111_v60 = vld [vmem:[#allocation3 + $0xd8] sm:$0xff] }
  0x24   :  { %1815 = vmatpush3.bf16.msra.mxu1 %v1814_v39  ;;  %v125_v58 = vld [vmem:[#allocation3 + $0x148] sm:$0xff]  ;;  %v142_v61 = vld [vmem:[#allocation3 + $0x1d0] sm:$0xff]  ;;  %v143_v62 = vld [vmem:[#allocation3 + $0x1d8] sm:$0xff]  ;;  %v1790_v63 = vpack.c.bf16 %v93_v55, %v92_v54  ;;  %v1792_v1 = vpack.c.bf16 %v111_v60, %v110_v59 }
  0x25   :  { %1817 = vmatprep.subr.bf16.mxu1 %v1816_v44  ;;  %v1822_v0 = vpack.c.bf16 %v125_v58, %v124_v56  ;;  %v94_v2 = vld [vmem:[#allocation3 + $0x50] sm:$0xff]  ;;  %v95_v3 = vld [vmem:[#allocation3 + $0x58] sm:$0xff]  ;;  %v1824_v5 = vpack.c.bf16 %v143_v62, %v142_v61  ;;  %v112_v7 = vld [vmem:[#allocation3 + $0xe0] sm:$0xff] }
  0x26   :  { %1787 = vmatpush3.bf16.msra.mxu0 %v1786_v49  ;;  %v126_v4 = vld [vmem:[#allocation3 + $0x150] sm:$0xff]  ;;  %v127_v6 = vld [vmem:[#allocation3 + $0x158] sm:$0xff]  ;;  %v113_v8 = vld [vmem:[#allocation3 + $0xe8] sm:$0xff]  ;;  %v1794_v11 = vpack.c.bf16 %v95_v3, %v94_v2 }
  0x27   :  { %1789 = vmatprep.subr.bf16.mxu0 %v1788_v53  ;;  %v144_v9 = vld [vmem:[#allocation3 + $0x1e0] sm:$0xff]  ;;  %v145_v10 = vld [vmem:[#allocation3 + $0x1e8] sm:$0xff]  ;;  %v1826_v14 = vpack.c.bf16 %v127_v6, %v126_v4  ;;  %v1796_v15 = vpack.c.bf16 %v113_v8, %v112_v7  ;;  %v114_v20 = vld [vmem:[#allocation3 + $0xf0] sm:$0xff] }
  0x28   :  { %1819 = vmatpush3.bf16.msra.mxu1 %v1818_v52  ;;  %v96_v12 = vld [vmem:[#allocation3 + $0x60] sm:$0xff]  ;;  %v97_v13 = vld [vmem:[#allocation3 + $0x68] sm:$0xff]  ;;  %v1828_v19 = vpack.c.bf16 %v145_v10, %v144_v9  ;;  %v115_v21 = vld [vmem:[#allocation3 + $0xf8] sm:$0xff] }
  0x29   :  { %1821 = vmatprep.subr.bf16.mxu1 %v1820_v57  ;;  %v128_v16 = vld [vmem:[#allocation3 + $0x160] sm:$0xff]  ;;  %v129_v17 = vld [vmem:[#allocation3 + $0x168] sm:$0xff]  ;;  %v55_v22 = vld [vmem:[%s2630_s0 + $0x18] sm:$0xff]  ;;  %v1798_v25 = vpack.c.bf16 %v97_v13, %v96_v12  ;;  %v1800_v27 = vpack.c.bf16 %v115_v21, %v114_v20 }
  0x2a   :  { %1791 = vmatpush3.bf16.msra.mxu0 %v1790_v63  ;;  %v53_v18 = vld [vmem:[%s2630_s0 + $0x8] sm:$0xff]  ;;  %v146_v23 = vld [vmem:[#allocation3 + $0x1f0] sm:$0xff]  ;;  %v147_v24 = vld [vmem:[#allocation3 + $0x1f8] sm:$0xff]  ;;  %486 = vmatprep.mubr.f32.mxu1 %v55_v22  ;;  %v1830_v26 = vpack.c.bf16 %v129_v17, %v128_v16 }
  0x2b   :  { %1793 = vmatprep.subr.bf16.mxu0 %v1792_v1  ;;  %411 = vmatprep.mubr.f32.mxu0 %v53_v18  ;;  %v98_v28 = vld [vmem:[#allocation3 + $0x70] sm:$0xff]  ;;  %v99_v29 = vld [vmem:[#allocation3 + $0x78] sm:$0xff]  ;;  %v1832_v31 = vpack.c.bf16 %v147_v24, %v146_v23  ;;  %v164_v33 = vld [vmem:[#allocation3 + $0x280] sm:$0xff] }
  0x2c   :  { %1823 = vmatpush3.bf16.msra.mxu1 %v1822_v0  ;;  %v130_v30 = vld [vmem:[#allocation3 + $0x170] sm:$0xff]  ;;  %v131_v32 = vld [vmem:[#allocation3 + $0x178] sm:$0xff]  ;;  %v165_v34 = vld [vmem:[#allocation3 + $0x288] sm:$0xff]  ;;  %v1802_v37 = vpack.c.bf16 %v99_v29, %v98_v28 }
  0x2d   :  { %1825 = vmatprep.subr.bf16.mxu1 %v1824_v5  ;;  %v196_v35 = vld [vmem:[#allocation3 + $0x380] sm:$0xff]  ;;  %v197_v36 = vld [vmem:[#allocation3 + $0x388] sm:$0xff]  ;;  %v1834_v38 = vpack.c.bf16 %v131_v32, %v130_v30  ;;  %v1836_v39 = vpack.c.bf16 %v165_v34, %v164_v33  ;;  %v166_v45 = vld [vmem:[#allocation3 + $0x290] sm:$0xff] }
  0x2e   :  { %1795 = vmatpush3.bf16.msra.mxu0 %v1794_v11  ;;  %v148_v40 = vld [vmem:[#allocation3 + $0x200] sm:$0xff]  ;;  %v149_v41 = vld [vmem:[#allocation3 + $0x208] sm:$0xff]  ;;  %v1868_v43 = vpack.c.bf16 %v197_v36, %v196_v35  ;;  %v167_v46 = vld [vmem:[#allocation3 + $0x298] sm:$0xff] }
  0x2f   :  { %1797 = vmatprep.subr.bf16.mxu0 %v1796_v15  ;;  %v180_v42 = vld [vmem:[#allocation3 + $0x300] sm:$0xff]  ;;  %v181_v44 = vld [vmem:[#allocation3 + $0x308] sm:$0xff]  ;;  %v198_v47 = vld [vmem:[#allocation3 + $0x390] sm:$0xff]  ;;  %v1838_v50 = vpack.c.bf16 %v149_v41, %v148_v40  ;;  %v1840_v53 = vpack.c.bf16 %v167_v46, %v166_v45 }
  0x30   :  { %1827 = vmatpush3.bf16.msra.mxu1 %v1826_v14  ;;  %v199_v48 = vld [vmem:[#allocation3 + $0x398] sm:$0xff]  ;;  %v54_v51 = vld [vmem:[%s2630_s0 + $0x10] sm:$0xff]  ;;  %v1870_v52 = vpack.c.bf16 %v181_v44, %v180_v42  ;;  %v168_v59 = vld [vmem:[#allocation3 + $0x2a0] sm:$0xff] }
  0x31   :  { %1829 = vmatprep.subr.bf16.mxu1 %v1828_v19  ;;  %v52_v49 = vld [vmem:[%s2630_s0] sm:$0xff]  ;;  %v150_v54 = vld [vmem:[#allocation3 + $0x210] sm:$0xff]  ;;  %v1872_v57 = vpack.c.bf16 %v199_v48, %v198_v47  ;;  %v169_v60 = vld [vmem:[#allocation3 + $0x2a8] sm:$0xff] }
  0x32   :  { %1799 = vmatpush3.bf16.msra.mxu0 %v1798_v25  ;;  %v151_v55 = vld [vmem:[#allocation3 + $0x218] sm:$0xff]  ;;  %v182_v56 = vld [vmem:[#allocation3 + $0x310] sm:$0xff]  ;;  %v200_v61 = vld [vmem:[#allocation3 + $0x3a0] sm:$0xff]  ;;  %v1844_v1 = vpack.c.bf16 %v169_v60, %v168_v59 }
  0x33   :  { %1801 = vmatprep.subr.bf16.mxu0 %v1800_v27  ;;  %v183_v58 = vld [vmem:[#allocation3 + $0x318] sm:$0xff]  ;;  %v201_v62 = vld [vmem:[#allocation3 + $0x3a8] sm:$0xff]  ;;  %v1842_v63 = vpack.c.bf16 %v151_v55, %v150_v54  ;;  %v152_v2 = vld [vmem:[#allocation3 + $0x220] sm:$0xff] }
  0x34   :  { %1831 = vmatpush3.bf16.msra.mxu1 %v1830_v26  ;;  %v1874_v0 = vpack.c.bf16 %v183_v58, %v182_v56  ;;  %v153_v3 = vld [vmem:[#allocation3 + $0x228] sm:$0xff]  ;;  %v184_v4 = vld [vmem:[#allocation3 + $0x320] sm:$0xff]  ;;  %v1876_v5 = vpack.c.bf16 %v201_v62, %v200_v61  ;;  %v170_v7 = vld [vmem:[#allocation3 + $0x2b0] sm:$0xff] }
  0x35   :  { %1833 = vmatprep.subr.bf16.mxu1 %v1832_v31  ;;  %v185_v6 = vld [vmem:[#allocation3 + $0x328] sm:$0xff]  ;;  %v171_v8 = vld [vmem:[#allocation3 + $0x2b8] sm:$0xff]  ;;  %v202_v9 = vld [vmem:[#allocation3 + $0x3b0] sm:$0xff]  ;;  %v1846_v11 = vpack.c.bf16 %v153_v3, %v152_v2 }
  0x36   :  { %1803 = vmatpush3.bf16.msra.mxu0 %v1802_v37  ;;  %v203_v10 = vld [vmem:[#allocation3 + $0x3b8] sm:$0xff]  ;;  %v154_v12 = vld [vmem:[#allocation3 + $0x230] sm:$0xff]  ;;  %v1878_v15 = vpack.c.bf16 %v185_v6, %v184_v4  ;;  %v1848_v16 = vpack.c.bf16 %v171_v8, %v170_v7  ;;  %v69_v18 = vld [vmem:[%s2630_s0 + $0x88] sm:$0xff] }
  0x37   :  { %1837 = vmatprep.subr.bf16.mxu0 %v1836_v39  ;;  %v155_v13 = vld [vmem:[#allocation3 + $0x238] sm:$0xff]  ;;  %v186_v14 = vld [vmem:[#allocation3 + $0x330] sm:$0xff]  ;;  %v1880_v20 = vpack.c.bf16 %v203_v10, %v202_v9  ;;  %v172_v21 = vld [vmem:[#allocation3 + $0x2c0] sm:$0xff] }
  0x38   :  { %1835 = vmatpush3.bf16.msra.mxu1 %v1834_v38  ;;  %v187_v17 = vld [vmem:[#allocation3 + $0x338] sm:$0xff]  ;;  %v173_v22 = vld [vmem:[#allocation3 + $0x2c8] sm:$0xff]  ;;  %v204_v24 = vld [vmem:[#allocation3 + $0x3c0] sm:$0xff]  ;;  %v1850_v26 = vpack.c.bf16 %v155_v13, %v154_v12 }
  0x39   :  { %1869 = vmatprep.subr.bf16.mxu1 %v1868_v43  ;;  %412 = vmatmul.mubr.f32.vlgmr.msra.gmra.mrb[0].mxu0 %v52_v49  ;;  %v68_v19 = vld [vmem:[%s2630_s0 + $0x80] sm:$0xff]  ;;  %v71_v23 = vld [vmem:[%s2630_s0 + $0x98] sm:$0xff]  ;;  %v205_v25 = vld [vmem:[#allocation3 + $0x3c8] sm:$0xff]  ;;  %v1882_v30 = vpack.c.bf16 %v187_v17, %v186_v14  ;;  %v1852_v31 = vpack.c.bf16 %v173_v22, %v172_v21 }
  0x3a   :  { %1839 = vmatpush3.bf16.msra.mxu0 %v1838_v50  ;;  %416 = vmatprep.mubr.f32.mxu0 %v69_v18  ;;  %v156_v27 = vld [vmem:[#allocation3 + $0x240] sm:$0xff]  ;;  %v157_v28 = vld [vmem:[#allocation3 + $0x248] sm:$0xff]  ;;  %v1884_v35 = vpack.c.bf16 %v205_v25, %v204_v24  ;;  %v174_v36 = vld [vmem:[#allocation3 + $0x2d0] sm:$0xff] }
  0x3b   :  { %487 = vmatmul.mubr.f32.vlgmr.msra.gmra.mrb[0].mxu1 %v54_v51  ;;  %1841 = vmatprep.subr.bf16.mxu0 %v1840_v53  ;;  %v70_v29 = vld [vmem:[%s2630_s0 + $0x90] sm:$0xff]  ;;  %v188_v32 = vld [vmem:[#allocation3 + $0x340] sm:$0xff]  ;;  %v175_v37 = vld [vmem:[#allocation3 + $0x2d8] sm:$0xff]  ;;  %v1854_v41 = vpack.c.bf16 %v157_v28, %v156_v27 }
  0x3c   :  { %1871 = vmatpush3.bf16.msra.mxu1 %v1870_v52  ;;  %491 = vmatprep.mubr.f32.mxu1 %v71_v23  ;;  %v189_v33 = vld [vmem:[#allocation3 + $0x348] sm:$0xff]  ;;  %v59_v38 = vld [vmem:[%s2630_s0 + $0x38] sm:$0xff]  ;;  %v1856_v43 = vpack.c.bf16 %v175_v37, %v174_v36  ;;  %v176_v49 = vld [vmem:[#allocation3 + $0x2e0] sm:$0xff] }
  0x3d   :  { %1873 = vmatprep.subr.bf16.mxu1 %v1872_v57  ;;  %417 = vmatmul.mubr.f32.gmra.mrb[2].mxu0 %v68_v19  ;;  %v57_v34 = vld [vmem:[%s2630_s0 + $0x28] sm:$0xff]  ;;  %v206_v39 = vld [vmem:[#allocation3 + $0x3d0] sm:$0xff]  ;;  %v207_v40 = vld [vmem:[#allocation3 + $0x3d8] sm:$0xff]  ;;  %v1886_v42 = vpack.c.bf16 %v189_v33, %v188_v32 }
  0x3e   :  { %1843 = vmatpush3.bf16.msra.mxu0 %v1842_v63  ;;  %561 = vmatprep.mubr.f32.mxu0 %v57_v34  ;;  %v158_v44 = vld [vmem:[#allocation3 + $0x250] sm:$0xff]  ;;  %v159_v45 = vld [vmem:[#allocation3 + $0x258] sm:$0xff]  ;;  %v1888_v47 = vpack.c.bf16 %v207_v40, %v206_v39  ;;  %v177_v50 = vld [vmem:[#allocation3 + $0x2e8] sm:$0xff] }
  0x3f   :  { %1845 = vmatprep.subr.bf16.mxu0 %v1844_v1  ;;  %492 = vmatmul.mubr.f32.gmra.mrb[2].mxu1 %v70_v29  ;;  %v190_v46 = vld [vmem:[#allocation3 + $0x350] sm:$0xff]  ;;  %v191_v48 = vld [vmem:[#allocation3 + $0x358] sm:$0xff]  ;;  %v208_v51 = vld [vmem:[#allocation3 + $0x3e0] sm:$0xff]  ;;  %v1858_v53 = vpack.c.bf16 %v159_v45, %v158_v44  ;;  %v1860_v55 = vpack.c.bf16 %v177_v50, %v176_v49 }
  0x40   :  { %1875 = vmatpush3.bf16.msra.mxu1 %v1874_v0  ;;  %636 = vmatprep.mubr.f32.mxu1 %v59_v38  ;;  %v209_v52 = vld [vmem:[#allocation3 + $0x3e8] sm:$0xff]  ;;  %v1890_v54 = vpack.c.bf16 %v191_v48, %v190_v46  ;;  %v160_v56 = vld [vmem:[#allocation3 + $0x260] sm:$0xff]  ;;  %v178_v61 = vld [vmem:[#allocation3 + $0x2f0] sm:$0xff] }
  0x41   :  { %1877 = vmatprep.subr.bf16.mxu1 %v1876_v5  ;;  %v161_v57 = vld [vmem:[#allocation3 + $0x268] sm:$0xff]  ;;  %v192_v58 = vld [vmem:[#allocation3 + $0x360] sm:$0xff]  ;;  %v1892_v59 = vpack.c.bf16 %v209_v52, %v208_v51  ;;  %v179_v62 = vld [vmem:[#allocation3 + $0x2f8] sm:$0xff] }
  0x42   :  { %1847 = vmatpush3.bf16.msra.mxu0 %v1846_v11  ;;  %v193_v60 = vld [vmem:[#allocation3 + $0x368] sm:$0xff]  ;;  %v210_v63 = vld [vmem:[#allocation3 + $0x3f0] sm:$0xff]  ;;  %v211_v0 = vld [vmem:[#allocation3 + $0x3f8] sm:$0xff]  ;;  %v1862_v1 = vpack.c.bf16 %v161_v57, %v160_v56  ;;  %v1864_v3 = vpack.c.bf16 %v179_v62, %v178_v61 }
  0x43   :  { %1849 = vmatprep.subr.bf16.mxu0 %v1848_v16  ;;  %v1894_v2 = vpack.c.bf16 %v193_v60, %v192_v58  ;;  %v162_v4 = vld [vmem:[#allocation3 + $0x270] sm:$0xff]  ;;  %v163_v5 = vld [vmem:[#allocation3 + $0x278] sm:$0xff]  ;;  %v1896_v7 = vpack.c.bf16 %v211_v0, %v210_v63  ;;  %v228_v9 = vld [vmem:[#allocation3 + $0x480] sm:$0xff] }
  0x44   :  { %1879 = vmatpush3.bf16.msra.mxu1 %v1878_v15  ;;  %v194_v6 = vld [vmem:[#allocation3 + $0x370] sm:$0xff]  ;;  %v195_v8 = vld [vmem:[#allocation3 + $0x378] sm:$0xff]  ;;  %v229_v10 = vld [vmem:[#allocation3 + $0x488] sm:$0xff]  ;;  %v1866_v13 = vpack.c.bf16 %v163_v5, %v162_v4 }
  0x45   :  { %1881 = vmatprep.subr.bf16.mxu1 %v1880_v20  ;;  %v260_v11 = vld [vmem:[#allocation3 + $0x580] sm:$0xff]  ;;  %v261_v12 = vld [vmem:[#allocation3 + $0x588] sm:$0xff]  ;;  %v1898_v14 = vpack.c.bf16 %v195_v8, %v194_v6  ;;  %v1900_v15 = vpack.c.bf16 %v229_v10, %v228_v9  ;;  %v230_v23 = vld [vmem:[#allocation3 + $0x490] sm:$0xff] }
  0x46   :  { %1851 = vmatpush3.bf16.msra.mxu0 %v1850_v26  ;;  %v212_v16 = vld [vmem:[#allocation3 + $0x400] sm:$0xff]  ;;  %v213_v17 = vld [vmem:[#allocation3 + $0x408] sm:$0xff]  ;;  %v1932_v19 = vpack.c.bf16 %v261_v12, %v260_v11  ;;  %v231_v24 = vld [vmem:[#allocation3 + $0x498] sm:$0xff] }
  0x47   :  { %1853 = vmatprep.subr.bf16.mxu0 %v1852_v31  ;;  %v56_v18 = vld [vmem:[%s2630_s0 + $0x20] sm:$0xff]  ;;  %v245_v21 = vld [vmem:[#allocation3 + $0x508] sm:$0xff]  ;;  %v1902_v25 = vpack.c.bf16 %v213_v17, %v212_v16  ;;  %v262_v27 = vld [vmem:[#allocation3 + $0x590] sm:$0xff]  ;;  %v1904_v33 = vpack.c.bf16 %v231_v24, %v230_v23 }
  0x48   :  { %1883 = vmatpush3.bf16.msra.mxu1 %v1882_v30  ;;  %v244_v20 = vld [vmem:[#allocation3 + $0x500] sm:$0xff]  ;;  %v58_v22 = vld [vmem:[%s2630_s0 + $0x30] sm:$0xff]  ;;  %v263_v28 = vld [vmem:[#allocation3 + $0x598] sm:$0xff] }
  0x49   :  { %1885 = vmatprep.subr.bf16.mxu1 %v1884_v35  ;;  %v73_v26 = vld [vmem:[%s2630_s0 + $0xa8] sm:$0xff]  ;;  %v1934_v29 = vpack.c.bf16 %v245_v21, %v244_v20  ;;  %v214_v30 = vld [vmem:[#allocation3 + $0x410] sm:$0xff]  ;;  %v215_v31 = vld [vmem:[#allocation3 + $0x418] sm:$0xff]  ;;  %v1936_v38 = vpack.c.bf16 %v263_v28, %v262_v27 }
  0x4a   :  { %1855 = vmatpush3.bf16.msra.mxu0 %v1854_v41  ;;  %v246_v32 = vld [vmem:[#allocation3 + $0x510] sm:$0xff]  ;;  %v247_v34 = vld [vmem:[#allocation3 + $0x518] sm:$0xff]  ;;  %v232_v35 = vld [vmem:[#allocation3 + $0x4a0] sm:$0xff] }
  0x4b   :  { %1857 = vmatprep.subr.bf16.mxu0 %v1856_v43  ;;  %v233_v36 = vld [vmem:[#allocation3 + $0x4a8] sm:$0xff]  ;;  %v75_v37 = vld [vmem:[%s2630_s0 + $0xb8] sm:$0xff]  ;;  %v264_v39 = vld [vmem:[#allocation3 + $0x5a0] sm:$0xff]  ;;  %v1938_v44 = vpack.c.bf16 %v247_v34, %v246_v32 }
  0x4c   :  { %1887 = vmatpush3.bf16.msra.mxu1 %v1886_v42  ;;  %v265_v40 = vld [vmem:[#allocation3 + $0x5a8] sm:$0xff]  ;;  %v72_v41 = vld [vmem:[%s2630_s0 + $0xa0] sm:$0xff]  ;;  %v1906_v42 = vpack.c.bf16 %v215_v31, %v214_v30  ;;  %v1908_v45 = vpack.c.bf16 %v233_v36, %v232_v35  ;;  %v234_v51 = vld [vmem:[#allocation3 + $0x4b0] sm:$0xff] }
  0x4d   :  { %1889 = vmatprep.subr.bf16.mxu1 %v1888_v47  ;;  %v74_v43 = vld [vmem:[%s2630_s0 + $0xb0] sm:$0xff]  ;;  %v216_v46 = vld [vmem:[#allocation3 + $0x420] sm:$0xff]  ;;  %v1940_v49 = vpack.c.bf16 %v265_v40, %v264_v39  ;;  %v235_v52 = vld [vmem:[#allocation3 + $0x4b8] sm:$0xff] }
  0x4e   :  { %1859 = vmatpush3.bf16.msra.mxu0 %v1858_v53  ;;  %v217_v47 = vld [vmem:[#allocation3 + $0x428] sm:$0xff]  ;;  %v248_v48 = vld [vmem:[#allocation3 + $0x520] sm:$0xff]  ;;  %v266_v53 = vld [vmem:[#allocation3 + $0x5b0] sm:$0xff] }
  0x4f   :  { %1861 = vmatprep.subr.bf16.mxu0 %v1860_v55  ;;  %v249_v50 = vld [vmem:[#allocation3 + $0x528] sm:$0xff]  ;;  %v1910_v56 = vpack.c.bf16 %v217_v47, %v216_v46  ;;  %v63_v57 = vld [vmem:[%s2630_s0 + $0x58] sm:$0xff]  ;;  %v220_v8 = vld [vmem:[#allocation3 + $0x440] sm:$0xff] }
  0x50   :  { %1891 = vmatpush3.bf16.msra.mxu1 %v1890_v54  ;;  %v267_v54 = vld [vmem:[#allocation3 + $0x5b8] sm:$0xff]  ;;  %v61_v55 = vld [vmem:[%s2630_s0 + $0x48] sm:$0xff]  ;;  %v1942_v58 = vpack.c.bf16 %v249_v50, %v248_v48  ;;  %v218_v60 = vld [vmem:[#allocation3 + $0x430] sm:$0xff] }
  0x51   :  { %1893 = vmatprep.subr.bf16.mxu1 %v1892_v59  ;;  %v1912_v59 = vpack.c.bf16 %v235_v52, %v234_v51  ;;  %v219_v61 = vld [vmem:[#allocation3 + $0x438] sm:$0xff]  ;;  %v250_v62 = vld [vmem:[#allocation3 + $0x530] sm:$0xff]  ;;  %v1944_v63 = vpack.c.bf16 %v267_v54, %v266_v53  ;;  %v269_v4 = vld [vmem:[#allocation3 + $0x5c8] sm:$0xff] }
  0x52   :  { %1863 = vmatpush3.bf16.msra.mxu0 %v1862_v1  ;;  %v251_v0 = vld [vmem:[#allocation3 + $0x538] sm:$0xff]  ;;  %v236_v1 = vld [vmem:[#allocation3 + $0x4c0] sm:$0xff]  ;;  %v1914_v5 = vpack.c.bf16 %v219_v61, %v218_v60  ;;  %v221_v9 = vld [vmem:[#allocation3 + $0x448] sm:$0xff] }
  0x53   :  { %1865 = vmatprep.subr.bf16.mxu0 %v1864_v3  ;;  %v268_v3 = vld [vmem:[#allocation3 + $0x5c0] sm:$0xff]  ;;  %v1946_v6 = vpack.c.bf16 %v251_v0, %v250_v62  ;;  %v253_v12 = vld [vmem:[#allocation3 + $0x548] sm:$0xff]  ;;  %v271_v16 = vld [vmem:[#allocation3 + $0x5d8] sm:$0xff]  ;;  %v1918_v17 = vpack.c.bf16 %v221_v9, %v220_v8 }
  0x54   :  { %1895 = vmatpush3.bf16.msra.mxu1 %v1894_v2  ;;  %v237_v2 = vld [vmem:[#allocation3 + $0x4c8] sm:$0xff]  ;;  %v252_v10 = vld [vmem:[#allocation3 + $0x540] sm:$0xff]  ;;  %v1948_v11 = vpack.c.bf16 %v269_v4, %v268_v3  ;;  %v222_v20 = vld [vmem:[#allocation3 + $0x450] sm:$0xff] }
  0x55   :  { %1897 = vmatprep.subr.bf16.mxu1 %v1896_v7  ;;  %v1916_v7 = vpack.c.bf16 %v237_v2, %v236_v1  ;;  %v223_v21 = vld [vmem:[#allocation3 + $0x458] sm:$0xff]  ;;  %v272_v27 = vld [vmem:[#allocation3 + $0x5e0] sm:$0xff]  ;;  %v273_v28 = vld [vmem:[#allocation3 + $0x5e8] sm:$0xff] }
  0x56   :  { %1867 = vmatpush3.bf16.msra.mxu0 %v1866_v13  ;;  %v238_v13 = vld [vmem:[#allocation3 + $0x4d0] sm:$0xff]  ;;  %v255_v24 = vld [vmem:[#allocation3 + $0x558] sm:$0xff]  ;;  %v224_v32 = vld [vmem:[#allocation3 + $0x460] sm:$0xff]  ;;  %v1956_v35 = vpack.c.bf16 %v273_v28, %v272_v27 }
  0x57   :  { %1901 = vmatprep.subr.bf16.mxu0 %v1900_v15  ;;  %v270_v15 = vld [vmem:[#allocation3 + $0x5d0] sm:$0xff]  ;;  %v256_v34 = vld [vmem:[#allocation3 + $0x560] sm:$0xff]  ;;  %v257_v36 = vld [vmem:[#allocation3 + $0x568] sm:$0xff] }
  0x58   :  { %1899 = vmatpush3.bf16.msra.mxu1 %v1898_v14  ;;  %v239_v14 = vld [vmem:[#allocation3 + $0x4d8] sm:$0xff]  ;;  %v1952_v23 = vpack.c.bf16 %v271_v16, %v270_v15  ;;  %v274_v39 = vld [vmem:[#allocation3 + $0x5f0] sm:$0xff]  ;;  %v293_v50 = vld [vmem:[#allocation3 + $0x688] sm:$0xff] }
  0x59   :  { %1933 = vmatprep.subr.bf16.mxu1 %v1932_v19  ;;  %562 = vmatmul.mubr.f32.vlgmr.msra.gmra.mrb[4].mxu0 %v56_v18  ;;  %v1950_v18 = vpack.c.bf16 %v253_v12, %v252_v10  ;;  %v1920_v19 = vpack.c.bf16 %v239_v14, %v238_v13  ;;  %v275_v40 = vld [vmem:[#allocation3 + $0x5f8] sm:$0xff]  ;;  %v258_v46 = vld [vmem:[#allocation3 + $0x570] sm:$0xff]  ;;  %v324_v51 = vld [vmem:[#allocation3 + $0x780] sm:$0xff] }
  0x5a   :  { %1903 = vmatpush3.bf16.msra.mxu0 %v1902_v25  ;;  %566 = vmatprep.mubr.f32.mxu0 %v73_v26  ;;  %v240_v25 = vld [vmem:[#allocation3 + $0x4e0] sm:$0xff]  ;;  %v241_v26 = vld [vmem:[#allocation3 + $0x4e8] sm:$0xff]  ;;  %v1960_v47 = vpack.c.bf16 %v275_v40, %v274_v39  ;;  %v259_v48 = vld [vmem:[#allocation3 + $0x578] sm:$0xff] }
  0x5b   :  { %637 = vmatmul.mubr.f32.vlgmr.msra.gmra.mrb[4].mxu1 %v58_v22  ;;  %1905 = vmatprep.subr.bf16.mxu0 %v1904_v33  ;;  %v254_v22 = vld [vmem:[#allocation3 + $0x550] sm:$0xff]  ;;  %v1924_v31 = vpack.c.bf16 %v241_v26, %v240_v25  ;;  %v225_v33 = vld [vmem:[#allocation3 + $0x468] sm:$0xff]  ;;  %v1962_v54 = vpack.c.bf16 %v259_v48, %v258_v46  ;;  %v308_v60 = vld [vmem:[#allocation3 + $0x700] sm:$0xff] }
  0x5c   :  { %1935 = vmatpush3.bf16.msra.mxu1 %v1934_v29  ;;  %641 = vmatprep.mubr.f32.mxu1 %v75_v37  ;;  %v1922_v29 = vpack.c.bf16 %v223_v21, %v222_v20  ;;  %v1954_v30 = vpack.c.bf16 %v255_v24, %v254_v22  ;;  %v242_v37 = vld [vmem:[#allocation3 + $0x4f0] sm:$0xff]  ;;  %v325_v52 = vld [vmem:[#allocation3 + $0x788] sm:$0xff]  ;;  %v295_v0 = vld [vmem:[#allocation3 + $0x698] sm:$0xff] }
  0x5d   :  { %567 = vmatmul.mubr.f32.gmra.mrb[6].mxu0 %v72_v41  ;;  %1937 = vmatprep.subr.bf16.mxu1 %v1936_v38  ;;  %v243_v38 = vld [vmem:[#allocation3 + $0x4f8] sm:$0xff]  ;;  %v1926_v41 = vpack.c.bf16 %v225_v33, %v224_v32  ;;  %v309_v61 = vld [vmem:[#allocation3 + $0x708] sm:$0xff]  ;;  %v326_v3 = vld [vmem:[#allocation3 + $0x790] sm:$0xff] }
  0x5e   :  { %1907 = vmatpush3.bf16.msra.mxu0 %v1906_v42  ;;  %711 = vmatprep.mubr.f32.mxu0 %v61_v55  ;;  %v1958_v42 = vpack.c.bf16 %v257_v36, %v256_v34  ;;  %v62_v62 = vld [vmem:[%s2630_s0 + $0x50] sm:$0xff]  ;;  %v77_v2 = vld [vmem:[%s2630_s0 + $0xc8] sm:$0xff]  ;;  %v327_v4 = vld [vmem:[#allocation3 + $0x798] sm:$0xff] }
  0x5f   :  { %642 = vmatmul.mubr.f32.gmra.mrb[6].mxu1 %v74_v43  ;;  %1909 = vmatprep.subr.bf16.mxu0 %v1908_v45  ;;  %v1928_v43 = vpack.c.bf16 %v243_v38, %v242_v37  ;;  %v227_v45 = vld [vmem:[#allocation3 + $0x478] sm:$0xff]  ;;  %v310_v8 = vld [vmem:[#allocation3 + $0x710] sm:$0xff]  ;;  %v297_v12 = vld [vmem:[#allocation3 + $0x6a8] sm:$0xff]  ;;  %v2000_v14 = vpack.c.bf16 %v327_v4, %v326_v3 }
  0x60   :  { %1939 = vmatpush3.bf16.msra.mxu1 %v1938_v44  ;;  %786 = vmatprep.mubr.f32.mxu1 %v63_v57  ;;  %v226_v44 = vld [vmem:[#allocation3 + $0x470] sm:$0xff]  ;;  %v277_v57 = vld [vmem:[#allocation3 + $0x608] sm:$0xff]  ;;  %v311_v10 = vld [vmem:[#allocation3 + $0x718] sm:$0xff] }
  0x61   :  { %1941 = vmatprep.subr.bf16.mxu1 %v1940_v49  ;;  %v292_v49 = vld [vmem:[#allocation3 + $0x680] sm:$0xff]  ;;  %v1930_v53 = vpack.c.bf16 %v227_v45, %v226_v44  ;;  %v79_v13 = vld [vmem:[%s2630_s0 + $0xd8] sm:$0xff]  ;;  %v329_v16 = vld [vmem:[#allocation3 + $0x7a8] sm:$0xff]  ;;  %v2002_v20 = vpack.c.bf16 %v311_v10, %v310_v8 }
  0x62   :  { %1911 = vmatpush3.bf16.msra.mxu0 %v1910_v56  ;;  %v1964_v55 = vpack.c.bf16 %v293_v50, %v292_v49  ;;  %v276_v56 = vld [vmem:[#allocation3 + $0x600] sm:$0xff]  ;;  %v313_v26 = vld [vmem:[#allocation3 + $0x728] sm:$0xff]  ;;  %v298_v27 = vld [vmem:[#allocation3 + $0x6b0] sm:$0xff] }
  0x63   :  { %1913 = vmatprep.subr.bf16.mxu0 %v1912_v59  ;;  %v1996_v59 = vpack.c.bf16 %v325_v52, %v324_v51  ;;  %v1966_v1 = vpack.c.bf16 %v277_v57, %v276_v56  ;;  %v328_v15 = vld [vmem:[#allocation3 + $0x7a0] sm:$0xff]  ;;  %v299_v28 = vld [vmem:[#allocation3 + $0x6b8] sm:$0xff]  ;;  %v282_v36 = vld [vmem:[#allocation3 + $0x630] sm:$0xff] }
  0x64   :  { %1943 = vmatpush3.bf16.msra.mxu1 %v1942_v58  ;;  %v60_v58 = vld [vmem:[%s2630_s0 + $0x40] sm:$0xff]  ;;  %v2004_v25 = vpack.c.bf16 %v329_v16, %v328_v15  ;;  %v67_v33 = vld [vmem:[%s2630_s0 + $0x78] sm:$0xff]  ;;  %v333_v44 = vld [vmem:[#allocation3 + $0x7c8] sm:$0xff] }
  0x65   :  { %1945 = vmatprep.subr.bf16.mxu1 %v1944_v63  ;;  %v294_v63 = vld [vmem:[#allocation3 + $0x690] sm:$0xff]  ;;  %v280_v22 = vld [vmem:[#allocation3 + $0x620] sm:$0xff]  ;;  %v283_v37 = vld [vmem:[#allocation3 + $0x638] sm:$0xff] }
  0x66   :  { %1915 = vmatpush3.bf16.msra.mxu0 %v1914_v5  ;;  %v1998_v5 = vpack.c.bf16 %v309_v61, %v308_v60  ;;  %v1968_v9 = vpack.c.bf16 %v295_v0, %v294_v63  ;;  %v312_v24 = vld [vmem:[#allocation3 + $0x720] sm:$0xff]  ;;  %v314_v38 = vld [vmem:[#allocation3 + $0x730] sm:$0xff]  ;;  %v315_v40 = vld [vmem:[#allocation3 + $0x738] sm:$0xff]  ;;  %v1978_v45 = vpack.c.bf16 %v283_v37, %v282_v36 }
  0x67   :  { %1917 = vmatprep.subr.bf16.mxu0 %v1916_v7  ;;  %v279_v7 = vld [vmem:[#allocation3 + $0x618] sm:$0xff]  ;;  %v2006_v34 = vpack.c.bf16 %v313_v26, %v312_v24  ;;  %v2010_v46 = vpack.c.bf16 %v315_v40, %v314_v38  ;;  %v284_v48 = vld [vmem:[#allocation3 + $0x640] sm:$0xff]  ;;  %v285_v49 = vld [vmem:[#allocation3 + $0x648] sm:$0xff]  ;;  %v2196_v38 = vmov 0  }
  0x68   :  { %1947 = vmatpush3.bf16.msra.mxu1 %v1946_v6  ;;  %v278_v6 = vld [vmem:[#allocation3 + $0x610] sm:$0xff]  ;;  %v316_v50 = vld [vmem:[#allocation3 + $0x740] sm:$0xff]  ;;  %v317_v52 = vld [vmem:[#allocation3 + $0x748] sm:$0xff]  ;;  %v1982_v57 = vpack.c.bf16 %v285_v49, %v284_v48  ;;  %2125 = vset.pattern.permute.xlu0 %v2196_v38 }
  0x69   :  { %1949 = vmatprep.subr.bf16.mxu1 %v1948_v11  ;;  %v296_v11 = vld [vmem:[#allocation3 + $0x6a0] sm:$0xff]  ;;  %v335_v56 = vld [vmem:[#allocation3 + $0x7d8] sm:$0xff]  ;;  %v286_v60 = vld [vmem:[#allocation3 + $0x650] sm:$0xff] }
  0x6a   :  { %1919 = vmatpush3.bf16.msra.mxu0 %v1918_v17  ;;  %v76_v17 = vld [vmem:[%s2630_s0 + $0xc0] sm:$0xff]  ;;  %v1972_v21 = vpack.c.bf16 %v297_v12, %v296_v11  ;;  %v337_v4 = vld [vmem:[#allocation3 + $0x7e8] sm:$0xff]  ;;  %v338_v15 = vld [vmem:[#allocation3 + $0x7f0] sm:$0xff] }
  0x6b   :  { %1921 = vmatprep.subr.bf16.mxu0 %v1920_v19  ;;  %v78_v19 = vld [vmem:[%s2630_s0 + $0xd0] sm:$0xff]  ;;  %v287_v61 = vld [vmem:[#allocation3 + $0x658] sm:$0xff]  ;;  %v336_v3 = vld [vmem:[#allocation3 + $0x7e0] sm:$0xff] }
  0x6c   :  { %1951 = vmatpush3.bf16.msra.mxu1 %v1950_v18  ;;  %v1970_v18 = vpack.c.bf16 %v279_v7, %v278_v6  ;;  %v319_v0 = vld [vmem:[#allocation3 + $0x758] sm:$0xff]  ;;  %v288_v8 = vld [vmem:[#allocation3 + $0x660] sm:$0xff]  ;;  %v2020_v11 = vpack.c.bf16 %v337_v4, %v336_v3  ;;  %v321_v12 = vld [vmem:[#allocation3 + $0x768] sm:$0xff] }
  0x6d   :  { %1953 = vmatprep.subr.bf16.mxu1 %v1952_v23  ;;  %v281_v23 = vld [vmem:[#allocation3 + $0x628] sm:$0xff]  ;;  %v320_v10 = vld [vmem:[#allocation3 + $0x760] sm:$0xff]  ;;  %v339_v16 = vld [vmem:[#allocation3 + $0x7f8] sm:$0xff] }
  0x6e   :  { %1923 = vmatpush3.bf16.msra.mxu0 %v1922_v29  ;;  %v330_v29 = vld [vmem:[#allocation3 + $0x7b0] sm:$0xff]  ;;  %v1974_v32 = vpack.c.bf16 %v281_v23, %v280_v22  ;;  %v2024_v22 = vpack.c.bf16 %v339_v16, %v338_v15  ;;  %v323_v24 = vld [vmem:[#allocation3 + $0x778] sm:$0xff]  ;;  %v1041_v36 = vld [vmem:[%s2634_s4 + $0x8] sm:$0xff] }
  0x6f   :  { %1925 = vmatprep.subr.bf16.mxu0 %v1924_v31  ;;  %v65_v31 = vld [vmem:[%s2630_s0 + $0x68] sm:$0xff]  ;;  %v322_v23 = vld [vmem:[#allocation3 + $0x770] sm:$0xff]  ;;  %v1040_v40 = vld [vmem:[%s2634_s4] sm:$0xff] }
  0x70   :  { %1955 = vmatpush3.bf16.msra.mxu1 %v1954_v30  ;;  %v331_v30 = vld [vmem:[#allocation3 + $0x7b8] sm:$0xff]  ;;  %v2026_v26 = vpack.c.bf16 %v323_v24, %v322_v23  ;;  %v1049_v48 = vld [vmem:[%s2634_s4 + $0x48] sm:$0xff]  ;;  %v1062_v15 = vld [vmem:[%s2634_s4 + $0xb0] sm:$0xff] }
  0x71   :  { %1957 = vmatprep.subr.bf16.mxu1 %v1956_v35  ;;  %v1976_v35 = vpack.c.bf16 %v299_v28, %v298_v27  ;;  %v2008_v39 = vpack.c.bf16 %v331_v30, %v330_v29  ;;  %v64_v27 = vld [vmem:[%s2630_s0 + $0x60] sm:$0xff]  ;;  %v66_v28 = vld [vmem:[%s2630_s0 + $0x70] sm:$0xff]  ;;  %v81_v29 = vld [vmem:[%s2630_s0 + $0xe8] sm:$0xff] }
  0x72   :  { %1927 = vmatpush3.bf16.msra.mxu0 %v1926_v41  ;;  %v300_v41 = vld [vmem:[#allocation3 + $0x6c0] sm:$0xff]  ;;  %v83_v30 = vld [vmem:[%s2630_s0 + $0xf8] sm:$0xff]  ;;  %v1404_v3 = vld [vmem:[%s2633_s3] ss:$0 sm:$0xff] }
  0x73   :  { %1929 = vmatprep.subr.bf16.mxu0 %v1928_v43  ;;  %v332_v43 = vld [vmem:[#allocation3 + $0x7c0] sm:$0xff]  ;;  %v1043_v37 = vld [vmem:[%s2634_s4 + $0x18] sm:$0xff]  ;;  %v1066_v23 = vld [vmem:[%s2634_s4 + $0xd0] sm:$0xff] }
  0x74   :  { %1959 = vmatpush3.bf16.msra.mxu1 %v1958_v42  ;;  %v301_v42 = vld [vmem:[#allocation3 + $0x6c8] sm:$0xff]  ;;  %v2012_v51 = vpack.c.bf16 %v333_v44, %v332_v43  ;;  %v1047_v44 = vld [vmem:[%s2634_s4 + $0x38] sm:$0xff] }
  0x75   :  { %1961 = vmatprep.subr.bf16.mxu1 %v1960_v47  ;;  %v1980_v47 = vpack.c.bf16 %v301_v42, %v300_v41  ;;  %v1042_v41 = vld [vmem:[%s2634_s4 + $0x10] sm:$0xff]  ;;  %v1045_v42 = vld [vmem:[%s2634_s4 + $0x28] sm:$0xff]  ;;  %v1051_v49 = vld [vmem:[%s2634_s4 + $0x58] sm:$0xff] }
  0x76   :  { %1931 = vmatpush3.bf16.msra.mxu0 %v1930_v53  ;;  %v302_v53 = vld [vmem:[#allocation3 + $0x6d0] sm:$0xff]  ;;  %v2033_v43 = vpack.c.bf16 %v1042_v41, %v1040_v40  ;;  %v1065_v16 = vld [vmem:[%s2634_s4 + $0xc8] sm:$0xff] }
  0x77   :  { %1965 = vmatprep.subr.bf16.mxu0 %v1964_v55  ;;  %v334_v55 = vld [vmem:[#allocation3 + $0x7d0] sm:$0xff] }
  0x78   :  { %1963 = vmatpush3.bf16.msra.mxu1 %v1962_v54  ;;  %v303_v54 = vld [vmem:[#allocation3 + $0x6d8] sm:$0xff]  ;;  %v2016_v63 = vpack.c.bf16 %v335_v56, %v334_v55 }
  0x79   :  { %1997 = vmatprep.subr.bf16.mxu1 %v1996_v59  ;;  %712 = vmatmul.mubr.f32.vlgmr.msra.gmra.mrb[8].mxu0 %v60_v58  ;;  %v2014_v58 = vpack.c.bf16 %v317_v52, %v316_v50  ;;  %v1984_v59 = vpack.c.bf16 %v303_v54, %v302_v53  ;;  %v1048_v52 = vld [vmem:[%s2634_s4 + $0x40] sm:$0xff]  ;;  %v1050_v53 = vld [vmem:[%s2634_s4 + $0x50] sm:$0xff]  ;;  %v1053_v54 = vld [vmem:[%s2634_s4 + $0x68] sm:$0xff] }
  0x7a   :  { %1967 = vmatpush3.bf16.msra.mxu0 %v1966_v1  ;;  %716 = vmatprep.mubr.f32.mxu0 %v77_v2  ;;  %v304_v1 = vld [vmem:[#allocation3 + $0x6e0] sm:$0xff]  ;;  %v305_v2 = vld [vmem:[#allocation3 + $0x6e8] sm:$0xff]  ;;  %v1055_v55 = vld [vmem:[%s2634_s4 + $0x78] sm:$0xff]  ;;  %v2041_v56 = vpack.c.bf16 %v1050_v53, %v1048_v52 }
  0x7b   :  { %787 = vmatmul.mubr.f32.vlgmr.msra.gmra.mrb[8].mxu1 %v62_v62  ;;  %1969 = vmatprep.subr.bf16.mxu0 %v1968_v9  ;;  %v318_v62 = vld [vmem:[#allocation3 + $0x750] sm:$0xff]  ;;  %v1988_v7 = vpack.c.bf16 %v305_v2, %v304_v1  ;;  %v289_v9 = vld [vmem:[#allocation3 + $0x668] sm:$0xff]  ;;  %v1056_v1 = vld [vmem:[%s2634_s4 + $0x80] sm:$0xff] }
  0x7c   :  { %1999 = vmatpush3.bf16.msra.mxu1 %v1998_v5  ;;  %791 = vmatprep.mubr.f32.mxu1 %v79_v13  ;;  %v1986_v5 = vpack.c.bf16 %v287_v61, %v286_v60  ;;  %v2018_v6 = vpack.c.bf16 %v319_v0, %v318_v62  ;;  %v306_v13 = vld [vmem:[#allocation3 + $0x6f0] sm:$0xff]  ;;  %v1057_v60 = vld [vmem:[%s2634_s4 + $0x88] sm:$0xff] }
  0x7d   :  { %717 = vmatmul.mubr.f32.gmra.mrb[10].mxu0 %v76_v17  ;;  %2001 = vmatprep.subr.bf16.mxu1 %v2000_v14  ;;  %v307_v14 = vld [vmem:[#allocation3 + $0x6f8] sm:$0xff]  ;;  %v1990_v17 = vpack.c.bf16 %v289_v9, %v288_v8  ;;  %v1058_v2 = vld [vmem:[%s2634_s4 + $0x90] sm:$0xff] }
  0x7e   :  { %1971 = vmatpush3.bf16.msra.mxu0 %v1970_v18  ;;  %861 = vmatprep.mubr.f32.mxu0 %v65_v31  ;;  %v2022_v18 = vpack.c.bf16 %v321_v12, %v320_v10  ;;  %v80_v31 = vld [vmem:[%s2630_s0 + $0xe0] sm:$0xff]  ;;  %v1059_v61 = vld [vmem:[%s2634_s4 + $0x98] sm:$0xff] }
  0x7f   :  { %792 = vmatmul.mubr.f32.gmra.mrb[10].mxu1 %v78_v19  ;;  %1973 = vmatprep.subr.bf16.mxu0 %v1972_v21  ;;  %v1992_v19 = vpack.c.bf16 %v307_v14, %v306_v13  ;;  %v291_v21 = vld [vmem:[#allocation3 + $0x678] sm:$0xff]  ;;  %v2047_v0 = vpack.c.bf16 %v1059_v61, %v1057_v60 }
  0x80   :  { %2003 = vmatpush3.bf16.msra.mxu1 %v2002_v20  ;;  %936 = vmatprep.mubr.f32.mxu1 %v67_v33  ;;  %v290_v20 = vld [vmem:[#allocation3 + $0x670] sm:$0xff]  ;;  %v2193_v33 = vmov 0.0|0.0   ;;  %v1060_v14 = vld [vmem:[%s2634_s4 + $0xa0] sm:$0xff] }
  0x81   :  { %2005 = vmatprep.subr.bf16.mxu1 %v2004_v25  ;;  %v1994_v25 = vpack.c.bf16 %v291_v21, %v290_v20 }
  0x82   :  { %1975 = vmatpush3.bf16.msra.mxu0 %v1974_v32  ;;  %v82_v32 = vld [vmem:[%s2630_s0 + $0xf0] sm:$0xff] }
  0x83   :  { %1977 = vmatprep.subr.bf16.mxu0 %v1976_v35  ;;  %v1033_v35 = vld [vmem:[%s2631_s1] sm:$0x3] }
  0x84   :  { %2007 = vmatpush3.bf16.msra.mxu1 %v2006_v34  ;;  %v2195_v34 = vmov 0.0   ;;  %1036 = vperm.xlu0 %2125, %v1033_v35  }
  0x85   :  { %2009 = vmatprep.subr.bf16.mxu1 %v2008_v39  ;;  %v2031_v39 = vpack.c.bf16 %v1043_v37, %v1041_v36 }
  0x86   :  { %1979 = vmatpush3.bf16.msra.mxu0 %v1978_v45  ;;  %v1044_v45 = vld [vmem:[%s2634_s4 + $0x20] sm:$0xff] }
  0x87   :  { %1981 = vmatprep.subr.bf16.mxu0 %v1980_v47  ;;  %v2035_v47 = vpack.c.bf16 %v1047_v44, %v1045_v42 }
  0x88   :  { %2011 = vmatpush3.bf16.msra.mxu1 %v2010_v46  ;;  %v1046_v46 = vld [vmem:[%s2634_s4 + $0x30] sm:$0xff] }
  0x89   :  { %2013 = vmatprep.subr.bf16.mxu1 %v2012_v51  ;;  %v2037_v50 = vpack.c.bf16 %v1046_v46, %v1044_v45  ;;  %v2039_v51 = vpack.c.bf16 %v1051_v49, %v1049_v48 }
  0x8a   :  { %1983 = vmatpush3.bf16.msra.mxu0 %v1982_v57  ;;  %v2043_v57 = vpack.c.bf16 %v1055_v55, %v1053_v54 }
  0x8b   :  { %1985 = vmatprep.subr.bf16.mxu0 %v1984_v59  ;;  %v1054_v59 = vld [vmem:[%s2634_s4 + $0x70] sm:$0xff] }
  0x8c   :  { %2015 = vmatpush3.bf16.msra.mxu1 %v2014_v58  ;;  %v1052_v58 = vld [vmem:[%s2634_s4 + $0x60] sm:$0xff] }
  0x8d   :  { %2017 = vmatprep.subr.bf16.mxu1 %v2016_v63  ;;  %v2045_v62 = vpack.c.bf16 %v1054_v59, %v1052_v58 }
  0x8e   :  { %1987 = vmatpush3.bf16.msra.mxu0 %v1986_v5 }
  0x8f   :  { %1989 = vmatprep.subr.bf16.mxu0 %v1988_v7  ;;  %v1063_v7 = vld [vmem:[%s2634_s4 + $0xb8] sm:$0xff] }
  0x90   :  { %2019 = vmatpush3.bf16.msra.mxu1 %v2018_v6  ;;  %v1061_v6 = vld [vmem:[%s2634_s4 + $0xa8] sm:$0xff] }
  0x91   :  { %2021 = vmatprep.subr.bf16.mxu1 %v2020_v11  ;;  %v2049_v11 = vpack.c.bf16 %v1058_v2, %v1056_v1  ;;  %v2051_v13 = vpack.c.bf16 %v1063_v7, %v1061_v6 }
  0x92   :  { %1991 = vmatpush3.bf16.msra.mxu0 %v1990_v17  ;;  %v1067_v17 = vld [vmem:[%s2634_s4 + $0xd8] sm:$0xff] }
  0x93   :  { %1993 = vmatprep.subr.bf16.mxu0 %v1992_v19  ;;  %v2053_v19 = vpack.c.bf16 %v1062_v15, %v1060_v14  ;;  %v2055_v21 = vpack.c.bf16 %v1067_v17, %v1065_v16 }
  0x94   :  { %2023 = vmatpush3.bf16.msra.mxu1 %v2022_v18 }
  0x95   :  { %2025 = vmatprep.subr.bf16.mxu1 %v2024_v22  ;;  %v1064_v22 = vld [vmem:[%s2634_s4 + $0xc0] sm:$0xff] }
  0x96   :  { %1995 = vmatpush3.bf16.msra.mxu0 %v1994_v25  ;;  %v1069_v25 = vld [vmem:[%s2634_s4 + $0xe8] sm:$0xff] }
  0x97   :  { %2028 = vmatprep.subr.bf16.mxu0 %v2193_v33 }
  0x98   :  { %2027 = vmatpush3.bf16.msra.mxu1 %v2026_v26  ;;  %v1071_v26 = vld [vmem:[%s2634_s4 + $0xf8] sm:$0xff] }
  0x99   :  { %862 = vmatmul.mubr.f32.vlgmr.msra.gmra.mrb[12].mxu0 %v64_v27  ;;  %2032 = vmatprep.subr.bf16.mxu1 %v2031_v39 }
  0x9a   :  { %866 = vmatprep.mubr.f32.mxu0 %v81_v29  ;;  %v2057_v29 = vpack.c.bf16 %v1066_v23, %v1064_v22 }
  0x9b   :  { %937 = vmatmul.mubr.f32.vlgmr.msra.gmra.mrb[12].mxu1 %v66_v28 }
  0x9c   :  { %941 = vmatprep.mubr.f32.mxu1 %v83_v30  ;;  %2034 = vmatpush1.bf16.msra.mxu1 %v2033_v43 }
  0x9d   :  { %867 = vmatmul.mubr.f32.gmra.mrb[14].mxu0 %v80_v31  ;;  %2036 = vmatprep.subr.bf16.mxu1 %v2035_v47 }
  0x9e   :  { %1740 = vmatprep.mubr.msk.f32.mxu0 %vm2194_vm0, %v2195_v34 }
  0x9f   :  { %942 = vmatmul.mubr.f32.gmra.mrb[14].mxu1 %v82_v32  ;;  %v2059_v32 = vpack.c.bf16 %v1071_v26, %v1069_v25 }
  0xa0   :  { %1148 = vmatprep.mubr.f32.mxu1 %v2195_v34  ;;  %2038 = vmatpush1.bf16.msra.mxu1 %v2037_v50 }
  0xa1   :  { %2040 = vmatprep.subr.bf16.mxu1 %v2039_v51 }
  0xa4   :  { %2042 = vmatpush1.bf16.msra.mxu1 %v2041_v56 }
  0xa5   :  { %2044 = vmatprep.subr.bf16.mxu1 %v2043_v57 }
  0xa8   :  { %2046 = vmatpush1.bf16.msra.mxu1 %v2045_v62 }
  0xa9   :  { %2048 = vmatprep.subr.bf16.mxu1 %v2047_v0 }
  0xac   :  { %2050 = vmatpush1.bf16.msra.mxu1 %v2049_v11 }
  0xad   :  { %2052 = vmatprep.subr.bf16.mxu1 %v2051_v13 }
  0xb0   :  { %2054 = vmatpush1.bf16.msra.mxu1 %v2053_v19 }
  0xb1   :  { %2056 = vmatprep.subr.bf16.mxu1 %v2055_v21 }
  0xb4   :  { %2058 = vmatpush1.bf16.msra.mxu1 %v2057_v29 }
  0xb5   :  { %2060 = vmatprep.subr.bf16.mxu1 %v2059_v32 }
 0x10c   :  { %v1447_v63 = vpop.f32.mrb[0].mxu0 }
 0x10d   :  { %v1448_v4 = vpop.f32.mrb[1].mxu0 }
 0x10e   :  { %v1485_v5 = vpop.f32.mrb[0].mxu1  ;;  %v1449_v8 = vadd.f32 %v1448_v4, %v1447_v63 }
 0x10f   :  { %v1486_v9 = vpop.f32.mrb[1].mxu1 }
 0x110   :  { %v1487_v10 = vadd.f32 %v1486_v9, %v1485_v5  ;;  %v414_v12 = vadd.f32 %v1449_v8, %v1404_v3  ;;  %v1450_v20 = vpop.f32.mrb[2].mxu0  ;;  %v949_v5 = vlaneseq }
 0x111   :  { %v1451_v24 = vpop.f32.mrb[3].mxu0 }
 0x112   :  { %v489_v18 = vadd.f32 %v1487_v10, %v414_v12  ;;  %v1452_v27 = vadd.f32 %v1451_v24, %v1450_v20  ;;  %v1488_v28 = vpop.f32.mrb[2].mxu1  ;;  %v2464_v6 = vshrl.u32 %v949_v5, 7  ;;  %v952_v21 = vand.u32 127, %v949_v5  ;;  %v1187_v5 = vld [vmem:[%s2636_s6 + $0xa0] sm:$0xff] }
 0x113   :  { %v1489_v31 = vpop.f32.mrb[3].mxu1 }
 0x114   :  { %v419_v30 = vadd.f32 %v1452_v27, %v1404_v3  ;;  %v1490_v35 = vadd.f32 %v1489_v31, %v1488_v28  ;;  %v953_v12 = vmul.u32 8, %v2464_v6  ;;  %v1070_v31 = vld [vmem:[%s2634_s4 + $0xf0] sm:$0xff] }
 0x116   :  { %v494_v36 = vadd.f32 %v1490_v35, %v419_v30  ;;  %v955_v22 = vadd.s32 8, %v953_v12  ;;  %vm954_vm1 = vcmp.ge.s32.totalorder %v952_v21, %v953_v12  ;;  %v1068_v30 = vld [vmem:[%s2634_s4 + $0xe0] sm:$0xff] }
 0x117   :  { %v2061_v32 = vpack.c.bf16 %v1070_v31, %v1068_v30  ;;  %v1167_v35 = vld [vmem:[%s2636_s6] sm:$0xff]  ;;  %v1280_v30 = vld [vmem:[%s2638_s8 + $0x8] sm:$0xff] }
 0x118   :  { %vm956_vm2 = vcmp.lt.s32.totalorder %v952_v21, %v955_v22  ;;  %v1191_v12 = vld [vmem:[%s2636_s6 + $0xc0] sm:$0xff] }
 0x119   :  { %vm957_vm3 = vmand %vm954_vm1, %vm956_vm2  ;;  %2062 = vmatpush1.bf16.msra.mxu1 %v2061_v32  ;;  %v1281_v32 = vld [vmem:[%s2638_s8 + $0x10] sm:$0xff] }
 0x11a   :  { %v958_v29 = vsel %vm957_vm3, 1.0, %v2195_v34  ;;  %2099 = vmatprep.subr.bf16.mxu1 %v2193_v33 }
 0x12c   :  { %v1523_v37 = vpop.f32.mrb[4].mxu0 }
 0x12d   :  { %v1524_v38 = vpop.f32.mrb[5].mxu0 }
 0x12e   :  { %v1561_v39 = vpop.f32.mrb[4].mxu1  ;;  %v1525_v40 = vadd.f32 %v1524_v38, %v1523_v37  ;;  %v1169_v37 = vld [vmem:[%s2636_s6 + $0x10] sm:$0xff] }
 0x12f   :  { %v1562_v41 = vpop.f32.mrb[5].mxu1 }
 0x130   :  { %v1563_v42 = vadd.f32 %v1562_v41, %v1561_v39  ;;  %v564_v43 = vadd.f32 %v1525_v40, %v489_v18  ;;  %v1526_v44 = vpop.f32.mrb[6].mxu0  ;;  %v1170_v39 = vld [vmem:[%s2636_s6 + $0x18] sm:$0xff]  ;;  %v1171_v41 = vld [vmem:[%s2636_s6 + $0x20] sm:$0xff] }
 0x131   :  { %v1527_v45 = vpop.f32.mrb[7].mxu0  ;;  %v2067_v40 = vpack.c.bf16 %v1170_v39, %v1169_v37  ;;  %v1283_v37 = vld [vmem:[%s2638_s8 + $0x20] sm:$0xff] }
 0x132   :  { %v1564_v46 = vpop.f32.mrb[6].mxu1  ;;  %v639_v47 = vadd.f32 %v1563_v42, %v564_v43  ;;  %v1528_v48 = vadd.f32 %v1527_v45, %v1526_v44  ;;  %v1172_v42 = vld [vmem:[%s2636_s6 + $0x28] sm:$0xff]  ;;  %v1173_v44 = vld [vmem:[%s2636_s6 + $0x30] sm:$0xff]  ;;  %v1174_v45 = vld [vmem:[%s2636_s6 + $0x38] sm:$0xff] }
 0x133   :  { %v1565_v49 = vpop.f32.mrb[7].mxu1  ;;  %v2070_v43 = vpack.c.bf16 %v1172_v42, %v1171_v41  ;;  %v1286_v41 = vld [vmem:[%s2638_s8 + $0x38] sm:$0xff] }
 0x134   :  { %v1566_v50 = vadd.f32 %v1565_v49, %v1564_v46  ;;  %v569_v51 = vadd.f32 %v1528_v48, %v494_v36  ;;  %v1168_v36 = vld [vmem:[%s2636_s6 + $0x8] sm:$0xff]  ;;  %v2073_v46 = vpack.c.bf16 %v1174_v45, %v1173_v44 }
 0x135   :  { %v2064_v38 = vpack.c.bf16 %v1168_v36, %v1167_v35  ;;  %v1176_v48 = vld [vmem:[%s2636_s6 + $0x48] sm:$0xff]  ;;  %v1282_v35 = vld [vmem:[%s2638_s8 + $0x18] sm:$0xff] }
 0x136   :  { %v644_v52 = vadd.f32 %v1566_v50, %v569_v51  ;;  %v1037_v50 = vpop.permute.xlu0 %1036  ;;  %v2103_v36 = vpack.c.bf16 %v1282_v35, %v1281_v32  ;;  %v1288_v44 = vld [vmem:[%s2638_s8 + $0x48] sm:$0xff] }
 0x14c   :  { %v1599_v53 = vpop.f32.mrb[8].mxu0 }
 0x14d   :  { %v1600_v54 = vpop.f32.mrb[9].mxu0 }
 0x14e   :  { %v1637_v55 = vpop.f32.mrb[8].mxu1  ;;  %v1601_v56 = vadd.f32 %v1600_v54, %v1599_v53  ;;  %v1177_v54 = vld [vmem:[%s2636_s6 + $0x50] sm:$0xff] }
 0x14f   :  { %v1638_v57 = vpop.f32.mrb[9].mxu1 }
 0x150   :  { %v1639_v58 = vadd.f32 %v1638_v57, %v1637_v55  ;;  %v714_v59 = vadd.f32 %v1601_v56, %v639_v47  ;;  %v1602_v60 = vpop.f32.mrb[10].mxu0  ;;  %v1175_v47 = vld [vmem:[%s2636_s6 + $0x40] sm:$0xff]  ;;  %v1178_v55 = vld [vmem:[%s2636_s6 + $0x58] sm:$0xff] }
 0x151   :  { %v1603_v61 = vpop.f32.mrb[11].mxu0  ;;  %v2076_v49 = vpack.c.bf16 %v1176_v48, %v1175_v47  ;;  %v2079_v56 = vpack.c.bf16 %v1178_v55, %v1177_v54  ;;  %v1179_v57 = vld [vmem:[%s2636_s6 + $0x60] sm:$0xff]  ;;  %v1290_v47 = vld [vmem:[%s2638_s8 + $0x58] sm:$0xff] }
 0x152   :  { %v1640_v62 = vpop.f32.mrb[10].mxu1  ;;  %v789_v63 = vadd.f32 %v1639_v58, %v714_v59  ;;  %v1604_v0 = vadd.f32 %v1603_v61, %v1602_v60  ;;  %v1180_v58 = vld [vmem:[%s2636_s6 + $0x68] sm:$0xff]  ;;  %v1181_v60 = vld [vmem:[%s2636_s6 + $0x70] sm:$0xff]  ;;  %v1182_v61 = vld [vmem:[%s2636_s6 + $0x78] sm:$0xff] }
 0x153   :  { %v1641_v1 = vpop.f32.mrb[11].mxu1  ;;  %v2082_v59 = vpack.c.bf16 %v1180_v58, %v1179_v57 }
 0x154   :  { %v1642_v2 = vadd.f32 %v1641_v1, %v1640_v62  ;;  %v719_v3 = vadd.f32 %v1604_v0, %v644_v52  ;;  %v2085_v62 = vpack.c.bf16 %v1182_v61, %v1181_v60  ;;  %v1184_v0 = vld [vmem:[%s2636_s6 + $0x88] sm:$0xff] }
 0x156   :  { %v794_v4 = vadd.f32 %v1642_v2, %v719_v3  ;;  %v1185_v2 = vld [vmem:[%s2636_s6 + $0x90] sm:$0xff]  ;;  %v1186_v3 = vld [vmem:[%s2636_s6 + $0x98] sm:$0xff] }
 0x16c   :  { %v1675_v7 = vpop.f32.mrb[12].mxu0 }
 0x16d   :  { %v1676_v8 = vpop.f32.mrb[13].mxu0 }
 0x16e   :  { %v1713_v9 = vpop.f32.mrb[12].mxu1  ;;  %v1677_v10 = vadd.f32 %v1676_v8, %v1675_v7  ;;  %v1188_v7 = vld [vmem:[%s2636_s6 + $0xa8] sm:$0xff]  ;;  %v1189_v8 = vld [vmem:[%s2636_s6 + $0xb0] sm:$0xff] }
 0x16f   :  { %v1714_v11 = vpop.f32.mrb[13].mxu1 }
 0x170   :  { %v1715_v13 = vadd.f32 %v1714_v11, %v1713_v9  ;;  %v864_v14 = vadd.f32 %v1677_v10, %v789_v63  ;;  %v1678_v15 = vpop.f32.mrb[14].mxu0  ;;  %v1183_v63 = vld [vmem:[%s2636_s6 + $0x80] sm:$0xff]  ;;  %v2094_v9 = vpack.c.bf16 %v1188_v7, %v1187_v5  ;;  %v1190_v10 = vld [vmem:[%s2636_s6 + $0xb8] sm:$0xff] }
 0x171   :  { %v1679_v16 = vpop.f32.mrb[15].mxu0  ;;  %v2088_v1 = vpack.c.bf16 %v1184_v0, %v1183_v63  ;;  %v2097_v11 = vpack.c.bf16 %v1190_v10, %v1189_v8 }
 0x172   :  { %v1716_v17 = vpop.f32.mrb[14].mxu1  ;;  %v939_v18 = vadd.f32 %v1715_v13, %v864_v14  ;;  %v1680_v19 = vadd.f32 %v1679_v16, %v1678_v15  ;;  %v1076_v13 = vsub.s32 0, %v2464_v6  ;;  %v1072_v14 = vld [vmem:[%s2635_s5] sm:$0x3]  ;;  %v1080_v15 = vsub.s32 1, %v2464_v6 }
 0x173   :  { %v1717_v20 = vpop.f32.mrb[15].mxu1  ;;  %v1279_v6 = vld [vmem:[%s2638_s8] sm:$0xff] }
 0x174   :  { %v1718_v23 = vadd.f32 %v1717_v20, %v1716_v17  ;;  %v869_v24 = vadd.f32 %v1680_v19, %v794_v4  ;;  %v947_v26 = vmax.f32 %v939_v18, 0.0  ;;  %v2091_v4 = vpack.c.bf16 %v1186_v3, %v1185_v2 }
 0x175   :  { %v1077_v16 = vrot.slane %v1072_v14, %v1076_v13  ;;  %v1081_v17 = vrot.slane %v1072_v14, %v1080_v15  ;;  %v2100_v31 = vpack.c.bf16 %v1280_v30, %v1279_v6 }
 0x176   :  { %v944_v25 = vadd.f32 %v1718_v23, %v869_v24 }
 0x178   :  { %v948_v27 = vmax.f32 %v944_v25, 0.0 }
 0x17a   :  { %v2029_v28 = vpack.c.bf16 %v948_v27, %v947_v26 }
 0x17c   :  { %2030 = vmatpush3.bf16.msra.mxu0 %v2029_v28 }
 0x17d   :  { %2063 = vmatprep.subr.bf16.mxu0 %v2193_v33 }
 0x17f   :  { %1741 = vmatmul.mubr.msk.f32.vlgmr.msra.gmra.mrb[16].mxu0 %vm959_vm4, %v958_v29 }
 0x180   :  { %2065 = vmatpush1.bf16.msra.mxu0 %v2064_v38  ;;  %v1284_v38 = vld [vmem:[%s2638_s8 + $0x28] sm:$0xff] }
 0x181   :  { %2066 = vmatprep.subr.bf16.mxu0 %v2193_v33  ;;  %v2106_v39 = vpack.c.bf16 %v1284_v38, %v1283_v37 }
 0x184   :  { %2068 = vmatpush1.bf16.msra.mxu0 %v2067_v40  ;;  %v1285_v40 = vld [vmem:[%s2638_s8 + $0x30] sm:$0xff] }
 0x185   :  { %2069 = vmatprep.subr.bf16.mxu0 %v2193_v33  ;;  %v2109_v42 = vpack.c.bf16 %v1286_v41, %v1285_v40 }
 0x188   :  { %2071 = vmatpush1.bf16.msra.mxu0 %v2070_v43  ;;  %v1287_v43 = vld [vmem:[%s2638_s8 + $0x40] sm:$0xff] }
 0x189   :  { %2072 = vmatprep.subr.bf16.mxu0 %v2193_v33  ;;  %v2112_v45 = vpack.c.bf16 %v1288_v44, %v1287_v43 }
 0x18c   :  { %2074 = vmatpush1.bf16.msra.mxu0 %v2073_v46  ;;  %v1289_v46 = vld [vmem:[%s2638_s8 + $0x50] sm:$0xff] }
 0x18d   :  { %2075 = vmatprep.subr.bf16.mxu0 %v2193_v33  ;;  %v2115_v48 = vpack.c.bf16 %v1290_v47, %v1289_v46 }
 0x190   :  { %2077 = vmatpush1.bf16.msra.mxu0 %v2076_v49  ;;  %v1291_v49 = vld [vmem:[%s2638_s8 + $0x60] sm:$0xf] }
 0x191   :  { %2078 = vmatprep.subr.bf16.mxu0 %v2193_v33 }
 0x194   :  { %2080 = vmatpush1.bf16.msra.mxu0 %v2079_v56  ;;  %v1411_v56 = vld [vmem:[#allocation2] ss:$0 sm:$0xff] }
 0x195   :  { %2081 = vmatprep.subr.bf16.mxu0 %v2193_v33 }
 0x198   :  { %2083 = vmatpush1.bf16.msra.mxu0 %v2082_v59 }
 0x199   :  { %2084 = vmatprep.subr.bf16.mxu0 %v2193_v33 }
 0x19c   :  { %2086 = vmatpush1.bf16.msra.mxu0 %v2085_v62 }
 0x19d   :  { %2087 = vmatprep.subr.bf16.mxu0 %v2193_v33 }
 0x1a0   :  { %2089 = vmatpush1.bf16.msra.mxu0 %v2088_v1 }
 0x1a1   :  { %2090 = vmatprep.subr.bf16.mxu0 %v2193_v33 }
 0x1a4   :  { %2092 = vmatpush1.bf16.msra.mxu0 %v2091_v4 }
 0x1a5   :  { %2093 = vmatprep.subr.bf16.mxu0 %v2193_v33 }
 0x1a8   :  { %2095 = vmatpush1.bf16.msra.mxu0 %v2094_v9 }
 0x1a9   :  { %2096 = vmatprep.subr.bf16.mxu0 %v2193_v33 }
 0x1ac   :  { %2098 = vmatpush1.bf16.msra.mxu0 %v2097_v11 }
 0x1ad   :  { %1251 = vmatprep.subr.mxu0 %v2195_v34 }
 0x1b0   :  { %1252 = vmatpush1.msra.mxu0 %v1191_v12 }
 0x252   :  { %v1029_v51 = vpop.f32.mrb[16].mxu0 }
 0x253   :  { %v1039_v52 = vmul.f32 %v1037_v50, %v1029_v51  ;;  %v1742_v53 = vpop.f32.mrb[17].mxu0  ;;  %v1408_v50 = vld [vmem:[%s2637_s7] ss:$0 sm:$0xff]  ;;  %s2197_s7 = smov [#allocation6]  }
 0x254   :  { %s1395_s8 = sshll.u32 %s2197_s7, 4  ;;  %s1396_s8 = int_to_ptr.vmem [resolvable:$true] %s1395_s8 }
 0x255   :  { %1149 = vmatmul.mubr.f32.vlgmr.msra.gmra.mrb[16].mxu1 %v1039_v52  ;;  %s2164_s5 = scalar_lea.vmem %s1396_s8, 32  ;;  %p2169_p9 = scmp.lt.s32.totalorder %s1396_s8, %s1396_s8 }
 0x256   :  { %1769 = vmatprep.mubr.msk.f32.mxu1 %vm2194_vm0, %v2195_v34  ;;  %2101 = vmatpush3.bf16.msra.mxu1 %v2100_v31  ;;  %p2165_p8 = scmp.ne.s32.totalorder %s1396_s8, %s2164_s5  ;;  %p2170_p10 = scmp.lt.s32.totalorder %s2164_s5, %s2164_s5 }
 0x257   :  { %2102 = vmatprep.subr.bf16.mxu1 %v2193_v33 }
 0x258   :  { %p2171_p11 = por %p2170_p10, %p2169_p9 }
 0x25a   :  { %2104 = vmatpush3.bf16.msra.mxu1 %v2103_v36  ;;  %p2172_p12 = pnand %p2171_p11, %p2165_p8 }
 0x25b   :  { %2105 = vmatprep.subr.bf16.mxu1 %v2193_v33 }
 0x25e   :  { %2107 = vmatpush3.bf16.msra.mxu1 %v2106_v39 }
 0x25f   :  { %2108 = vmatprep.subr.bf16.mxu1 %v2193_v33 }
 0x262   :  { %2110 = vmatpush3.bf16.msra.mxu1 %v2109_v42 }
 0x263   :  { %2111 = vmatprep.subr.bf16.mxu1 %v2193_v33 }
 0x266   :  { %2113 = vmatpush3.bf16.msra.mxu1 %v2112_v45 }
 0x267   :  { %2114 = vmatprep.subr.bf16.mxu1 %v2193_v33 }
 0x26a   :  { %2116 = vmatpush3.bf16.msra.mxu1 %v2115_v48 }
 0x26b   :  { %1767 = vmatprep.subr.mxu1 %v2195_v34 }
 0x26e   :  { %1768 = vmatpush3.msk.msra.mxu1 %vm1303_vm6, %v1291_v49 }
 0x328   :  { %v1150_v18 = vpop.f32.mrb[16].mxu1 }
 0x329   :  { %v1151_v19 = vadd.f32 %v1150_v18, %v1077_v16  ;;  %v1152_v20 = vpop.f32.mrb[17].mxu1 }
 0x32a   :  { %v1153_v21 = vadd.f32 %v1152_v20, %v1081_v17 }
 0x32b   :  { %v1406_v22 = vmul.f32 -1.442695, %v1151_v19 }
 0x32c   :  { %v1407_v23 = vmul.f32 -1.442695, %v1153_v21 }
 0x32d   :  { %2126 = vpow2.f32 %v1406_v22 }
 0x32e   :  { %2128 = vpow2.f32 %v1407_v23 }
 0x337   :  { %v2127_v24 = vpop.eup %2126 }
 0x338   :  { %v2129_v25 = vpop.eup %2128  ;;  %v1161_v26 = vadd.f32 1.0, %v2127_v24 }
 0x339   :  { %v1162_v27 = vadd.f32 1.0, %v2129_v25 }
 0x33b   :  { %2130 = vrcp.f32 %v1162_v27 }
 0x33c   :  { %2132 = vrcp.f32 %v1161_v26 }
 0x345   :  { %v2131_v28 = vpop.eup %2130 }
 0x346   :  { %v2133_v29 = vpop.eup %2132  ;;  %1409 = vmatprep.mubr.msk.f32.mxu0 %vm1199_vm5, %v2131_v28 }
 0x347   :  { %1268 = vmatmul.mubr.f32.vlgmr.msra.gmra.mrb[18].mxu0 %v2133_v29 }
 0x41a   :  { %v1269_v51 = vpop.f32.mrb[18].mxu0 }
 0x41b   :  { %v1270_v52 = vadd.f32 %v1408_v50, %v1269_v51  ;;  %v1271_v53 = vpop.f32.mrb[19].mxu0 }
 0x41d   :  { %v1410_v54 = vmul.f32 -1.442695, %v1270_v52 }
 0x41f   :  { %2134 = vpow2.f32 %v1410_v54 }
 0x429   :  { %v2135_v55 = vpop.eup %2134 }
 0x42a   :  { %v1276_v33 = vadd.f32 1.0, %v2135_v55 }
 0x42c   :  { %2136 = vrcp.f32 %v1276_v33 }
 0x436   :  { %v2137_v34 = vpop.eup %2136 }
 0x437   :  { %1770 = vmatmul.mubr.msk.f32.vlgmr.msra.gmra.mrb[18].mxu1 %vm1299_vm7, %v2137_v34 }
 0x50a   :  { %v1373_v57 = vpop.f32.mrb[18].mxu1 }
 0x50b   :  { %v1374_v58 = vadd.f32 %v1411_v56, %v1373_v57  ;;  %v1771_v59 = vpop.f32.mrb[19].mxu1 }
 0x50d   :  { %v1414_v60 = vmul.f32 -1.442695, %v1374_v58 }
 0x50f   :  { %2138 = vpow2.f32 %v1414_v60 }
 0x519   :  { %v2139_v61 = vpop.eup %2138 }
 0x51a   :  { %v1380_v62 = vadd.f32 1.0, %v2139_v61 }
 0x51c   :  { %2140 = vrcp.f32 %v1380_v62 }
 0x526   :  { %v2141_v63 = vpop.eup %2140 }
 0x527   :  { %1385 = vperm.xlu0 %2125, %v2141_v63  }
 0x5a6   :  { %v1386_v0 = vpop.permute.xlu0 %1385 }
 0x5a7   :  { %1388 = vst [vmem:[#allocation6] sm:$0x3] %v1386_v0 }
 0x5a8   :  { %2175 = shalt.err (!%p2172_p12)
}
 0x5a9   :  { %s2176_s23 = scalar_lea.hbm %s2640_s10, 32 }
 0x5aa   :  { %p2177_p13 = scmp.ne.s32.totalorder %s2640_s10, %s2176_s23  ;;  %p2180_p0 = scmp.lt.u32.totalorder %s2176_s23, %s2640_s10 }
 0x5ac   :  { %p2182_p1 = pnand %p2180_p0, %p2177_p13 }
 0x5ae   :  { %2185 = shalt.err (!%p2182_p1)
}
 0x5af   :  { %1398 = dma.vmem_to_hbm [thread:$0]  %s1396_s8, 32, %s2640_s10, [#allocation5]  }
 0x5b0   :  { %2188 = dma.done.wait [#allocation5], 32  }
 0x5b1   :  { %2189 = vsyncadd [#allocation5], 4294967264 }
 0x5b2   :  { %1402 = vsyncpa [#allocation4], 1 }
 0x5b3   :  { %1403 = vsyncpa [#allocation5], 1 }

</bundles_post_ra>
